<compile_context>
chip_gen: v5e
topology: v5e:2x2
jax: 0.10.0
libtpu: 0.0.40
codegen_flags: <defaults>
</compile_context>

<pallas_src>
import functools

import jax
import jax.numpy as jnp
from jax.experimental import pallas as pl
from jax.experimental.pallas import tpu as pltpu


# ----------------------------------------------------------------------------- #
# Pallas kernels (channels-first: channel on sublanes, batch*spatial on lanes)
# ----------------------------------------------------------------------------- #
def _fused_mlp_kernel(x_ref, w1_ref, b1_ref, w2_ref, b2_ref, o_ref, *, silu_out):
    """Fused 1x1-conv MLP: (W1 @ x + b1) -> SiLU -> (W2 @ . + b2) [-> SiLU].

    x_ref:  (Cin, tn)    w1_ref: (C1, Cin)    b1_ref: (C1, 1)
    w2_ref: (Cout, C1)   b2_ref: (Cout, 1)    o_ref:  (Cout, tn)
    """
    x = x_ref[...]
    if x_ref.shape[0] == 1:
        # Cin == 1: outer product on the VPU instead of a K=1 MXU matmul.
        h = w1_ref[...] * x                       # (C1,1)*(1,tn) broadcast
    else:
        h = jnp.dot(w1_ref[...], x, preferred_element_type=jnp.float32)
    h = h + b1_ref[...]
    h = h * jax.nn.sigmoid(h)                     # SiLU between MLP layers (f32)
    acc = jnp.dot(w2_ref[...], h, preferred_element_type=jnp.float32)
    acc = acc + b2_ref[...]
    if silu_out:
        acc = acc * jax.nn.sigmoid(acc)
    o_ref[...] = acc.astype(o_ref.dtype)          # (Cout, tn): full-lane stores


def _block_kernel(x_ref, w_ref, r_ref, o_ref, *, silu):
    """Fused FNO block tail: linear skip + spectral residual [+ SiLU].

    x_ref: (C, tn)   w_ref: (Cout, C)   r_ref/o_ref: (Cout, tn)
    """
    acc = jnp.dot(w_ref[...], x_ref[...], preferred_element_type=jnp.float32)
    acc = acc + r_ref[...]
    if silu:
        acc = acc * jax.nn.sigmoid(acc)
    o_ref[...] = acc.astype(o_ref.dtype)


def _spectral_kernel(x_ref, w_ref, o_ref):
    """All Fourier modes in one step: packed-complex contraction per mode.

    x_ref: (M, B, 2*Cin)        [xr | xi]
    w_ref: (M, 2*Cin, 2*Cout)   [[wr, wi], [-wi, wr]]   (packed at init time)
    o_ref: (M, B, 2*Cout)       [or | oi]
    """
    o_ref[...] = jnp.einsum(
        "mbk,mkn->mbn", x_ref[...], w_ref[...],
        preferred_element_type=jnp.float32,
    ).astype(o_ref.dtype)


# ----------------------------------------------------------------------------- #
# Tiling helper (lane axis = N = B*H*W)
# ----------------------------------------------------------------------------- #
def _col_tile(N):
    """Largest lane tile (multiple of 128) that divides N.

    Prefer an even grid >= 2 (v7x megacore sharding), else largest tile with a
    grid >= 2, else a single full-extent block (always legal).  No padding /
    slicing is ever needed around the pallas_calls.
    """
    best_any = 0
    best_even = 0
    for t in (4096, 2048, 1024, 512, 256, 128):
        if N % t == 0 and N // t >= 2:
            best_any = max(best_any, t)
            if (N // t) % 2 == 0:
                best_even = max(best_even, t)
    if best_even:
        return best_even
    if best_any:
        return best_any
    return N


# ----------------------------------------------------------------------------- #
# Wrappers
# ----------------------------------------------------------------------------- #
def fused_mlp(x_cf, w1, b1, w2, b2, *, silu_out=False):
    """Fused two-layer 1x1-conv MLP on channels-first rows: (Cin,N) -> (Cout,N)."""
    Cin, N = x_cf.shape
    C1 = w1.shape[0]
    Cout = w2.shape[0]
    tn = _col_tile(N)
    grid = (N // tn,)

    return pl.pallas_call(
        functools.partial(_fused_mlp_kernel, silu_out=silu_out),
        out_shape=jax.ShapeDtypeStruct((Cout, N), x_cf.dtype),
        grid_spec=pltpu.PrefetchScalarGridSpec(
            num_scalar_prefetch=0,
            grid=grid,
            in_specs=[
                pl.BlockSpec((Cin, tn), lambda j: (0, j)),
                pl.BlockSpec((C1, Cin), lambda j: (0, 0)),
                pl.BlockSpec((C1, 1), lambda j: (0, 0)),
                pl.BlockSpec((Cout, C1), lambda j: (0, 0)),
                pl.BlockSpec((Cout, 1), lambda j: (0, 0)),
            ],
            out_specs=pl.BlockSpec((Cout, tn), lambda j: (0, j)),
        ),
        compiler_params=pltpu.CompilerParams(dimension_semantics=("parallel",)),
    )(x_cf, w1, b1, w2, b2)


def fno_block_cf(x_cf, skip_w, spec_cf, *, silu):
    """out = skip_w @ x + spectral(x)   [+ SiLU], on channels-first rows."""
    C, N = x_cf.shape
    Cout = skip_w.shape[0]
    tn = _col_tile(N)
    grid = (N // tn,)

    return pl.pallas_call(
        functools.partial(_block_kernel, silu=silu),
        out_shape=jax.ShapeDtypeStruct((Cout, N), x_cf.dtype),
        grid_spec=pltpu.PrefetchScalarGridSpec(
            num_scalar_prefetch=0,
            grid=grid,
            in_specs=[
                pl.BlockSpec((C, tn), lambda j: (0, j)),
                pl.BlockSpec((Cout, C), lambda j: (0, 0)),
                pl.BlockSpec((Cout, tn), lambda j: (0, j)),
            ],
            out_specs=pl.BlockSpec((Cout, tn), lambda j: (0, j)),
        ),
        compiler_params=pltpu.CompilerParams(dimension_semantics=("parallel",)),
    )(x_cf, skip_w, spec_cf)


def _spectral_mix(x_packed, w_packed):
    """x_packed: (M,B,2Cin), w_packed: (M,2Cin,2Cout) -> (M,B,2Cout).

    Tiny operands (a few KiB) -> one grid step: pure-overhead mode blocking
    from the previous version is removed per the perf review.
    """
    M, B, K = x_packed.shape
    N2 = w_packed.shape[2]
    return pl.pallas_call(
        _spectral_kernel,
        out_shape=jax.ShapeDtypeStruct((M, B, N2), jnp.float32),
        grid_spec=pltpu.PrefetchScalarGridSpec(
            num_scalar_prefetch=0,
            grid=(1,),
            in_specs=[
                pl.BlockSpec((M, B, K), lambda i: (0, 0, 0)),
                pl.BlockSpec((M, K, N2), lambda i: (0, 0, 0)),
            ],
            out_specs=pl.BlockSpec((M, B, N2), lambda i: (0, 0, 0)),
        ),
    )(x_packed, w_packed)


def spectral_conv_cf(x_cf, bhw, w_packed, n_modes):
    """2-D spectral conv on channels-first rows: rFFT -> truncate -> packed-complex
    channel mixing (Pallas) -> re-embed (two static slice writes) -> irFFT."""
    B, H, W = bhw
    m1, m2 = n_modes
    C = x_cf.shape[0]
    Wf = W // 2 + 1
    M = 2 * m1 * m2
    Cout = w_packed.shape[2] // 2

    # Mode bands must not overlap / exceed the spectrum.
    assert H >= 2 * m1 and Wf >= m2, "n_modes too large for input resolution"

    x = x_cf.reshape(C, B, H, W)
    # TODO(synk): FFT/iFFT have no Pallas TPU primitive; they stay in XLA.
    xf = jnp.fft.rfft2(x.astype(jnp.float32), axes=(2, 3))        # (C, B, H, Wf)

    # mode truncation (tiny tensors; transposes are negligible vs the full grid)
    xm = jnp.concatenate([xf[:, :, :m1, :m2], xf[:, :, H - m1:, :m2]], axis=2)
    xm = xm.transpose(2, 3, 1, 0).reshape(M, B, C)                # (M, B, C) complex
    x_packed = jnp.concatenate([jnp.real(xm), jnp.imag(xm)], axis=-1)  # (M, B, 2C)

    out_packed = _spectral_mix(x_packed, w_packed)                # (M, B, 2Cout)
    out_m = jax.lax.complex(out_packed[..., :Cout], out_packed[..., Cout:])
    out_m = out_m.reshape(2 * m1, m2, B, Cout).transpose(3, 2, 0, 1)   # (Co,B,2m1,m2)

    # re-embed with two static writes into one zero spectrum (no band concat)
    out_f = jnp.zeros((Cout, B, H, Wf), out_m.dtype)
    out_f = out_f.at[:, :, :m1, :m2].set(out_m[:, :, :m1])
    out_f = out_f.at[:, :, H - m1:, :m2].set(out_m[:, :, m1:])

    out = jnp.fft.irfft2(out_f, s=(H, W), axes=(2, 3))            # (Cout, B, H, W)
    return out.reshape(Cout, B * H * W).astype(x_cf.dtype)


# ----------------------------------------------------------------------------- #
# FNO parameters + forward
# ----------------------------------------------------------------------------- #
def init_fno_params(key, *, n_modes, hidden_channels, in_channels, out_channels,
                    n_layers, lifting_channels, projection_channels):
    keys = jax.random.split(key, 8)

    def dense(k, cin, cout):
        # stored in left-multiply orientation: w (cout, cin), b (cout, 1)
        scale = 1.0 / jnp.sqrt(jnp.float32(cin))
        w = scale * jax.random.normal(k, (cout, cin), jnp.float32)
        b = scale * jax.random.normal(jax.random.fold_in(k, 1), (cout, 1), jnp.float32)
        return w, b

    p = {}
    # lifting MLP: in -> lifting -> hidden   (SiLU between)
    p["lift_w1"], p["lift_b1"] = dense(keys[0], in_channels, lifting_channels)
    p["lift_w2"], p["lift_b2"] = dense(keys[1], lifting_channels, hidden_channels)
    # projection MLP: hidden -> projection -> out   (SiLU between)
    p["proj_w1"], p["proj_b1"] = dense(keys[2], hidden_channels, projection_channels)
    p["proj_w2"], p["proj_b2"] = dense(keys[3], projection_channels, out_channels)

    m1, m2 = n_modes
    M = 2 * m1 * m2
    spec_scale = 1.0 / (hidden_channels * hidden_channels)
    p["spec_w_packed"], p["skip_w"] = [], []
    for layer in range(n_layers):
        k = jax.random.fold_in(keys[4], layer)
        wr = spec_scale * jax.random.normal(
            jax.random.fold_in(k, 0),
            (M, hidden_channels, hidden_channels), jnp.float32)
        wi = spec_scale * jax.random.normal(
            jax.random.fold_in(k, 1),
            (M, hidden_channels, hidden_channels), jnp.float32)
        # pack complex weights ONCE at init: [xr|xi] @ [[wr,wi],[-wi,wr]] = [or|oi]
        w_packed = jnp.concatenate(
            [jnp.concatenate([wr, wi], axis=-1),
             jnp.concatenate([-wi, wr], axis=-1)], axis=-2)       # (M, 2C, 2Cout)
        p["spec_w_packed"].append(w_packed)
        sw, _ = dense(jax.random.fold_in(k, 2), hidden_channels, hidden_channels)
        p["skip_w"].append(sw)  # linear skip (bias-free 1x1 conv)
    return p


def fno_forward(x, params, *, n_modes, n_layers):
    """x: (B, in_channels, H, W) float32 (NCHW, like the PyTorch module)."""
    B, Cin, H, W = x.shape
    bhw = (B, H, W)
    N = B * H * W

    # single boundary transpose NCHW -> channels-first rows (C, B*H*W)
    h = x.transpose(1, 0, 2, 3).reshape(Cin, N)

    # lifting MLP (fused: conv1 -> SiLU -> conv2)
    h = fused_mlp(h, params["lift_w1"], params["lift_b1"],
                  params["lift_w2"], params["lift_b2"], silu_out=False)

    # FNO blocks: spectral conv + linear skip, SiLU on all but the last block
    for layer in range(n_layers):
        spec = spectral_conv_cf(h, bhw, params["spec_w_packed"][layer], n_modes)
        h = fno_block_cf(h, params["skip_w"][layer], spec,
                         silu=(layer < n_layers - 1))

    # projection MLP (fused)
    y = fused_mlp(h, params["proj_w1"], params["proj_b1"],
                  params["proj_w2"], params["proj_b2"], silu_out=False)

    Cout = params["proj_w2"].shape[0]
    return y.reshape(Cout, B, H, W).transpose(1, 0, 2, 3)         # back to NCHW


# ----------------------------------------------------------------------------- #
if __name__ == "__main__":
    key = jax.random.PRNGKey(0)

    # Small config consistent with FNO(n_modes=(4,4), hidden_channels=8,
    #   in_channels=1, out_channels=1, n_layers=2, lifting_channels=32,
    #   projection_channels=32, non_linearity=F.silu)
    B, Cin, H, W = 2, 1, 16, 16
    n_modes = (4, 4)
    hidden_channels = 8
    out_channels = 1
    n_layers = 2

    params = init_fno_params(
        jax.random.fold_in(key, 1),
        n_modes=n_modes,
        hidden_channels=hidden_channels,
        in_channels=Cin,
        out_channels=out_channels,
        n_layers=n_layers,
        lifting_channels=32,
        projection_channels=32,
    )
    x = jax.random.normal(key, (B, Cin, H, W), jnp.float32)

    fwd = jax.jit(functools.partial(fno_forward, n_modes=n_modes, n_layers=n_layers))
    y = fwd(x, params)
    jax.block_until_ready(y)
    assert y.shape == (B, out_channels, H, W), y.shape
    assert y.dtype == jnp.float32
    assert bool(jnp.all(jnp.isfinite(y)))
    print("KERNEL_OK")
</pallas_src>

<mosaic_0001>
module attributes {stable_mosaic.version = 11 : i64} {
  func.func @_fused_mlp_kernel(%arg0: i32, %arg1: memref<1x256xf32, #tpu.memory_space<vmem>>, %arg2: memref<32x1xf32, #tpu.memory_space<vmem>>, %arg3: memref<32x1xf32, #tpu.memory_space<vmem>>, %arg4: memref<8x32xf32, #tpu.memory_space<vmem>>, %arg5: memref<8x1xf32, #tpu.memory_space<vmem>>, %arg6: memref<8x256xf32, #tpu.memory_space<vmem>>) attributes {dimension_semantics = [#tpu.dimension_semantics<parallel>], iteration_bounds = array<i64: 2>, scalar_prefetch = 0 : i64, scratch_operands = 0 : i64, tpu.core_type = #tpu.core_type<tc>, window_params = [{transform_indices = @transform_0, window_bounds = array<i64: 1, 256>}, {pipeline_mode = #tpu.pipeline_mode<synchronous>, transform_indices = @transform_1, window_bounds = array<i64: 32, 1>}, {pipeline_mode = #tpu.pipeline_mode<synchronous>, transform_indices = @transform_2, window_bounds = array<i64: 32, 1>}, {pipeline_mode = #tpu.pipeline_mode<synchronous>, transform_indices = @transform_3, window_bounds = array<i64: 8, 32>}, {pipeline_mode = #tpu.pipeline_mode<synchronous>, transform_indices = @transform_4, window_bounds = array<i64: 8, 1>}, {transform_indices = @transform_5, window_bounds = array<i64: 8, 256>}]} {
    %c0 = arith.constant 0 : index
    %c0_0 = arith.constant 0 : index
    %0 = vector.load %arg1[%c0, %c0_0] : memref<1x256xf32, #tpu.memory_space<vmem>>, vector<1x256xf32>
    %c0_1 = arith.constant 0 : index
    %c0_2 = arith.constant 0 : index
    %1 = vector.load %arg2[%c0_1, %c0_2] : memref<32x1xf32, #tpu.memory_space<vmem>>, vector<32x1xf32>
    %2 = vector.broadcast %1 : vector<32x1xf32> to vector<32x256xf32>
    %3 = vector.broadcast %0 : vector<1x256xf32> to vector<32x256xf32>
    %4 = arith.mulf %2, %3 : vector<32x256xf32>
    %c0_3 = arith.constant 0 : index
    %c0_4 = arith.constant 0 : index
    %5 = vector.load %arg3[%c0_3, %c0_4] : memref<32x1xf32, #tpu.memory_space<vmem>>, vector<32x1xf32>
    %6 = vector.broadcast %5 : vector<32x1xf32> to vector<32x256xf32>
    %7 = arith.addf %4, %6 : vector<32x256xf32>
    %8 = arith.negf %7 : vector<32x256xf32>
    %9 = math.exp %8 : vector<32x256xf32>
    %cst = arith.constant 1.000000e+00 : f32
    %10 = vector.broadcast %cst : f32 to vector<32x256xf32>
    %11 = arith.addf %10, %9 : vector<32x256xf32>
    %12 = arith.divf %10, %11 : vector<32x256xf32>
    %13 = arith.mulf %7, %12 : vector<32x256xf32>
    %c0_5 = arith.constant 0 : index
    %c0_6 = arith.constant 0 : index
    %14 = vector.load %arg4[%c0_5, %c0_6] : memref<8x32xf32, #tpu.memory_space<vmem>>, vector<8x32xf32>
    %cst_7 = arith.constant dense<0.000000e+00> : vector<8x256xf32>
    %15 = tpu.matmul %14, %13, %cst_7 {dimension_numbers = #tpu.dot_dimension_numbers<[1], [0], [0], [1], [0, 0, 1, 1], [], []>} : vector<8x32xf32>, vector<32x256xf32>, vector<8x256xf32> -> vector<8x256xf32>
    %c0_8 = arith.constant 0 : index
    %c0_9 = arith.constant 0 : index
    %16 = vector.load %arg5[%c0_8, %c0_9] : memref<8x1xf32, #tpu.memory_space<vmem>>, vector<8x1xf32>
    %17 = vector.broadcast %16 : vector<8x1xf32> to vector<8x256xf32>
    %18 = arith.addf %15, %17 : vector<8x256xf32>
    %c0_10 = arith.constant 0 : index
    %c0_11 = arith.constant 0 : index
    %19 = vector.load %arg6[%c0_10, %c0_11] : memref<8x256xf32, #tpu.memory_space<vmem>>, vector<8x256xf32>
    tpu.vector_store %arg6[%c0_10, %c0_11], %18 {strides = array<i32>} : memref<8x256xf32, #tpu.memory_space<vmem>>, vector<8x256xf32>,
    return
  }
  func.func @transform_0(%arg0: i32) -> (i32, i32) {
    %c0_i32 = arith.constant 0 : i32
    %c0_i32_0 = arith.constant 0 : i32
    return %c0_i32, %arg0 : i32, i32
  }
  func.func @transform_1(%arg0: i32) -> (i32, i32) {
    %c0_i32 = arith.constant 0 : i32
    %c0_i32_0 = arith.constant 0 : i32
    %c0_i32_1 = arith.constant 0 : i32
    return %c0_i32, %c0_i32_0 : i32, i32
  }
  func.func @transform_2(%arg0: i32) -> (i32, i32) {
    %c0_i32 = arith.constant 0 : i32
    %c0_i32_0 = arith.constant 0 : i32
    %c0_i32_1 = arith.constant 0 : i32
    return %c0_i32, %c0_i32_0 : i32, i32
  }
  func.func @transform_3(%arg0: i32) -> (i32, i32) {
    %c0_i32 = arith.constant 0 : i32
    %c0_i32_0 = arith.constant 0 : i32
    %c0_i32_1 = arith.constant 0 : i32
    return %c0_i32, %c0_i32_0 : i32, i32
  }
  func.func @transform_4(%arg0: i32) -> (i32, i32) {
    %c0_i32 = arith.constant 0 : i32
    %c0_i32_0 = arith.constant 0 : i32
    %c0_i32_1 = arith.constant 0 : i32
    return %c0_i32, %c0_i32_0 : i32, i32
  }
  func.func @transform_5(%arg0: i32) -> (i32, i32) {
    %c0_i32 = arith.constant 0 : i32
    %c0_i32_0 = arith.constant 0 : i32
    return %c0_i32, %arg0 : i32, i32
  }
}

module attributes {stable_mosaic.version = 11 : i64} {
  func.func @_spectral_kernel(%arg0: i32, %arg1: memref<32x2x16xf32, #tpu.memory_space<vmem>>, %arg2: memref<32x16x16xf32, #tpu.memory_space<vmem>>, %arg3: memref<32x2x16xf32, #tpu.memory_space<vmem>>) attributes {dimension_semantics = [#tpu.dimension_semantics<arbitrary>], iteration_bounds = array<i64: 1>, scalar_prefetch = 0 : i64, scratch_operands = 0 : i64, tpu.core_type = #tpu.core_type<tc>, window_params = [{pipeline_mode = #tpu.pipeline_mode<synchronous>, transform_indices = @transform_0, window_bounds = array<i64: 32, 2, 16>}, {pipeline_mode = #tpu.pipeline_mode<synchronous>, transform_indices = @transform_1, window_bounds = array<i64: 32, 16, 16>}, {pipeline_mode = #tpu.pipeline_mode<synchronous>, transform_indices = @transform_2, window_bounds = array<i64: 32, 2, 16>}]} {
    %c0 = arith.constant 0 : index
    %c0_0 = arith.constant 0 : index
    %c0_1 = arith.constant 0 : index
    %0 = vector.load %arg1[%c0, %c0_0, %c0_1] : memref<32x2x16xf32, #tpu.memory_space<vmem>>, vector<32x2x16xf32>
    %c0_2 = arith.constant 0 : index
    %c0_3 = arith.constant 0 : index
    %c0_4 = arith.constant 0 : index
    %1 = vector.load %arg2[%c0_2, %c0_3, %c0_4] : memref<32x16x16xf32, #tpu.memory_space<vmem>>, vector<32x16x16xf32>
    "tpu.trace_start"() <{level = 10 : i32, message = "mbk,mkn->mbn"}> : () -> ()
    %cst = arith.constant dense<0.000000e+00> : vector<32x2x16xf32>
    %2 = tpu.matmul %0, %1, %cst {dimension_numbers = #tpu.dot_dimension_numbers<[2], [1], [1], [2], [0, 0, 0, 1, 1, 2], [0], [0]>} : vector<32x2x16xf32>, vector<32x16x16xf32>, vector<32x2x16xf32> -> vector<32x2x16xf32>
    "tpu.trace_stop"() : () -> ()
    %c0_5 = arith.constant 0 : index
    %c0_6 = arith.constant 0 : index
    %c0_7 = arith.constant 0 : index
    %3 = vector.load %arg3[%c0_5, %c0_6, %c0_7] : memref<32x2x16xf32, #tpu.memory_space<vmem>>, vector<32x2x16xf32>
    tpu.vector_store %arg3[%c0_5, %c0_6, %c0_7], %2 {strides = array<i32>} : memref<32x2x16xf32, #tpu.memory_space<vmem>>, vector<32x2x16xf32>,
    return
  }
  func.func @transform_0(%arg0: i32) -> (i32, i32, i32) {
    %c0_i32 = arith.constant 0 : i32
    %c0_i32_0 = arith.constant 0 : i32
    %c0_i32_1 = arith.constant 0 : i32
    %c0_i32_2 = arith.constant 0 : i32
    return %c0_i32, %c0_i32_0, %c0_i32_1 : i32, i32, i32
  }
  func.func @transform_1(%arg0: i32) -> (i32, i32, i32) {
    %c0_i32 = arith.constant 0 : i32
    %c0_i32_0 = arith.constant 0 : i32
    %c0_i32_1 = arith.constant 0 : i32
    %c0_i32_2 = arith.constant 0 : i32
    return %c0_i32, %c0_i32_0, %c0_i32_1 : i32, i32, i32
  }
  func.func @transform_2(%arg0: i32) -> (i32, i32, i32) {
    %c0_i32 = arith.constant 0 : i32
    %c0_i32_0 = arith.constant 0 : i32
    %c0_i32_1 = arith.constant 0 : i32
    %c0_i32_2 = arith.constant 0 : i32
    return %c0_i32, %c0_i32_0, %c0_i32_1 : i32, i32, i32
  }
}

module attributes {stable_mosaic.version = 11 : i64} {
  func.func @_block_kernel(%arg0: i32, %arg1: memref<8x256xf32, #tpu.memory_space<vmem>>, %arg2: memref<8x8xf32, #tpu.memory_space<vmem>>, %arg3: memref<8x256xf32, #tpu.memory_space<vmem>>, %arg4: memref<8x256xf32, #tpu.memory_space<vmem>>) attributes {dimension_semantics = [#tpu.dimension_semantics<parallel>], iteration_bounds = array<i64: 2>, scalar_prefetch = 0 : i64, scratch_operands = 0 : i64, tpu.core_type = #tpu.core_type<tc>, window_params = [{transform_indices = @transform_0, window_bounds = array<i64: 8, 256>}, {pipeline_mode = #tpu.pipeline_mode<synchronous>, transform_indices = @transform_1, window_bounds = array<i64: 8, 8>}, {transform_indices = @transform_2, window_bounds = array<i64: 8, 256>}, {transform_indices = @transform_3, window_bounds = array<i64: 8, 256>}]} {
    %c0 = arith.constant 0 : index
    %c0_0 = arith.constant 0 : index
    %0 = vector.load %arg2[%c0, %c0_0] : memref<8x8xf32, #tpu.memory_space<vmem>>, vector<8x8xf32>
    %c0_1 = arith.constant 0 : index
    %c0_2 = arith.constant 0 : index
    %1 = vector.load %arg1[%c0_1, %c0_2] : memref<8x256xf32, #tpu.memory_space<vmem>>, vector<8x256xf32>
    %cst = arith.constant dense<0.000000e+00> : vector<8x256xf32>
    %2 = tpu.matmul %0, %1, %cst {dimension_numbers = #tpu.dot_dimension_numbers<[1], [0], [0], [1], [0, 0, 1, 1], [], []>} : vector<8x8xf32>, vector<8x256xf32>, vector<8x256xf32> -> vector<8x256xf32>
    %c0_3 = arith.constant 0 : index
    %c0_4 = arith.constant 0 : index
    %3 = vector.load %arg3[%c0_3, %c0_4] : memref<8x256xf32, #tpu.memory_space<vmem>>, vector<8x256xf32>
    %4 = arith.addf %2, %3 : vector<8x256xf32>
    %5 = arith.negf %4 : vector<8x256xf32>
    %6 = math.exp %5 : vector<8x256xf32>
    %cst_5 = arith.constant 1.000000e+00 : f32
    %7 = vector.broadcast %cst_5 : f32 to vector<8x256xf32>
    %8 = arith.addf %7, %6 : vector<8x256xf32>
    %9 = arith.divf %7, %8 : vector<8x256xf32>
    %10 = arith.mulf %4, %9 : vector<8x256xf32>
    %c0_6 = arith.constant 0 : index
    %c0_7 = arith.constant 0 : index
    %11 = vector.load %arg4[%c0_6, %c0_7] : memref<8x256xf32, #tpu.memory_space<vmem>>, vector<8x256xf32>
    tpu.vector_store %arg4[%c0_6, %c0_7], %10 {strides = array<i32>} : memref<8x256xf32, #tpu.memory_space<vmem>>, vector<8x256xf32>,
    return
  }
  func.func @transform_0(%arg0: i32) -> (i32, i32) {
    %c0_i32 = arith.constant 0 : i32
    %c0_i32_0 = arith.constant 0 : i32
    return %c0_i32, %arg0 : i32, i32
  }
  func.func @transform_1(%arg0: i32) -> (i32, i32) {
    %c0_i32 = arith.constant 0 : i32
    %c0_i32_0 = arith.constant 0 : i32
    %c0_i32_1 = arith.constant 0 : i32
    return %c0_i32, %c0_i32_0 : i32, i32
  }
  func.func @transform_2(%arg0: i32) -> (i32, i32) {
    %c0_i32 = arith.constant 0 : i32
    %c0_i32_0 = arith.constant 0 : i32
    return %c0_i32, %arg0 : i32, i32
  }
  func.func @transform_3(%arg0: i32) -> (i32, i32) {
    %c0_i32 = arith.constant 0 : i32
    %c0_i32_0 = arith.constant 0 : i32
    return %c0_i32, %arg0 : i32, i32
  }
}

module attributes {stable_mosaic.version = 11 : i64} {
  func.func @_block_kernel(%arg0: i32, %arg1: memref<8x256xf32, #tpu.memory_space<vmem>>, %arg2: memref<8x8xf32, #tpu.memory_space<vmem>>, %arg3: memref<8x256xf32, #tpu.memory_space<vmem>>, %arg4: memref<8x256xf32, #tpu.memory_space<vmem>>) attributes {dimension_semantics = [#tpu.dimension_semantics<parallel>], iteration_bounds = array<i64: 2>, scalar_prefetch = 0 : i64, scratch_operands = 0 : i64, tpu.core_type = #tpu.core_type<tc>, window_params = [{transform_indices = @transform_0, window_bounds = array<i64: 8, 256>}, {pipeline_mode = #tpu.pipeline_mode<synchronous>, transform_indices = @transform_1, window_bounds = array<i64: 8, 8>}, {transform_indices = @transform_2, window_bounds = array<i64: 8, 256>}, {transform_indices = @transform_3, window_bounds = array<i64: 8, 256>}]} {
    %c0 = arith.constant 0 : index
    %c0_0 = arith.constant 0 : index
    %0 = vector.load %arg2[%c0, %c0_0] : memref<8x8xf32, #tpu.memory_space<vmem>>, vector<8x8xf32>
    %c0_1 = arith.constant 0 : index
    %c0_2 = arith.constant 0 : index
    %1 = vector.load %arg1[%c0_1, %c0_2] : memref<8x256xf32, #tpu.memory_space<vmem>>, vector<8x256xf32>
    %cst = arith.constant dense<0.000000e+00> : vector<8x256xf32>
    %2 = tpu.matmul %0, %1, %cst {dimension_numbers = #tpu.dot_dimension_numbers<[1], [0], [0], [1], [0, 0, 1, 1], [], []>} : vector<8x8xf32>, vector<8x256xf32>, vector<8x256xf32> -> vector<8x256xf32>
    %c0_3 = arith.constant 0 : index
    %c0_4 = arith.constant 0 : index
    %3 = vector.load %arg3[%c0_3, %c0_4] : memref<8x256xf32, #tpu.memory_space<vmem>>, vector<8x256xf32>
    %4 = arith.addf %2, %3 : vector<8x256xf32>
    %c0_5 = arith.constant 0 : index
    %c0_6 = arith.constant 0 : index
    %5 = vector.load %arg4[%c0_5, %c0_6] : memref<8x256xf32, #tpu.memory_space<vmem>>, vector<8x256xf32>
    tpu.vector_store %arg4[%c0_5, %c0_6], %4 {strides = array<i32>} : memref<8x256xf32, #tpu.memory_space<vmem>>, vector<8x256xf32>,
    return
  }
  func.func @transform_0(%arg0: i32) -> (i32, i32) {
    %c0_i32 = arith.constant 0 : i32
    %c0_i32_0 = arith.constant 0 : i32
    return %c0_i32, %arg0 : i32, i32
  }
  func.func @transform_1(%arg0: i32) -> (i32, i32) {
    %c0_i32 = arith.constant 0 : i32
    %c0_i32_0 = arith.constant 0 : i32
    %c0_i32_1 = arith.constant 0 : i32
    return %c0_i32, %c0_i32_0 : i32, i32
  }
  func.func @transform_2(%arg0: i32) -> (i32, i32) {
    %c0_i32 = arith.constant 0 : i32
    %c0_i32_0 = arith.constant 0 : i32
    return %c0_i32, %arg0 : i32, i32
  }
  func.func @transform_3(%arg0: i32) -> (i32, i32) {
    %c0_i32 = arith.constant 0 : i32
    %c0_i32_0 = arith.constant 0 : i32
    return %c0_i32, %arg0 : i32, i32
  }
}

module attributes {stable_mosaic.version = 11 : i64} {
  func.func @_fused_mlp_kernel(%arg0: i32, %arg1: memref<8x256xf32, #tpu.memory_space<vmem>>, %arg2: memref<32x8xf32, #tpu.memory_space<vmem>>, %arg3: memref<32x1xf32, #tpu.memory_space<vmem>>, %arg4: memref<1x32xf32, #tpu.memory_space<vmem>>, %arg5: memref<1x1xf32, #tpu.memory_space<vmem>>, %arg6: memref<1x256xf32, #tpu.memory_space<vmem>>) attributes {dimension_semantics = [#tpu.dimension_semantics<parallel>], iteration_bounds = array<i64: 2>, scalar_prefetch = 0 : i64, scratch_operands = 0 : i64, tpu.core_type = #tpu.core_type<tc>, window_params = [{transform_indices = @transform_0, window_bounds = array<i64: 8, 256>}, {pipeline_mode = #tpu.pipeline_mode<synchronous>, transform_indices = @transform_1, window_bounds = array<i64: 32, 8>}, {pipeline_mode = #tpu.pipeline_mode<synchronous>, transform_indices = @transform_2, window_bounds = array<i64: 32, 1>}, {pipeline_mode = #tpu.pipeline_mode<synchronous>, transform_indices = @transform_3, window_bounds = array<i64: 1, 32>}, {pipeline_mode = #tpu.pipeline_mode<synchronous>, transform_indices = @transform_4, window_bounds = array<i64: 1, 1>}, {transform_indices = @transform_5, window_bounds = array<i64: 1, 256>}]} {
    %c0 = arith.constant 0 : index
    %c0_0 = arith.constant 0 : index
    %0 = vector.load %arg1[%c0, %c0_0] : memref<8x256xf32, #tpu.memory_space<vmem>>, vector<8x256xf32>
    %c0_1 = arith.constant 0 : index
    %c0_2 = arith.constant 0 : index
    %1 = vector.load %arg2[%c0_1, %c0_2] : memref<32x8xf32, #tpu.memory_space<vmem>>, vector<32x8xf32>
    %cst = arith.constant dense<0.000000e+00> : vector<32x256xf32>
    %2 = tpu.matmul %1, %0, %cst {dimension_numbers = #tpu.dot_dimension_numbers<[1], [0], [0], [1], [0, 0, 1, 1], [], []>} : vector<32x8xf32>, vector<8x256xf32>, vector<32x256xf32> -> vector<32x256xf32>
    %c0_3 = arith.constant 0 : index
    %c0_4 = arith.constant 0 : index
    %3 = vector.load %arg3[%c0_3, %c0_4] : memref<32x1xf32, #tpu.memory_space<vmem>>, vector<32x1xf32>
    %4 = vector.broadcast %3 : vector<32x1xf32> to vector<32x256xf32>
    %5 = arith.addf %2, %4 : vector<32x256xf32>
    %6 = arith.negf %5 : vector<32x256xf32>
    %7 = math.exp %6 : vector<32x256xf32>
    %cst_5 = arith.constant 1.000000e+00 : f32
    %8 = vector.broadcast %cst_5 : f32 to vector<32x256xf32>
    %9 = arith.addf %8, %7 : vector<32x256xf32>
    %10 = arith.divf %8, %9 : vector<32x256xf32>
    %11 = arith.mulf %5, %10 : vector<32x256xf32>
    %c0_6 = arith.constant 0 : index
    %c0_7 = arith.constant 0 : index
    %12 = vector.load %arg4[%c0_6, %c0_7] : memref<1x32xf32, #tpu.memory_space<vmem>>, vector<1x32xf32>
    %cst_8 = arith.constant dense<0.000000e+00> : vector<1x256xf32>
    %13 = tpu.matmul %12, %11, %cst_8 {dimension_numbers = #tpu.dot_dimension_numbers<[1], [0], [0], [1], [0, 0, 1, 1], [], []>} : vector<1x32xf32>, vector<32x256xf32>, vector<1x256xf32> -> vector<1x256xf32>
    %c0_9 = arith.constant 0 : index
    %c0_10 = arith.constant 0 : index
    %14 = vector.load %arg5[%c0_9, %c0_10] : memref<1x1xf32, #tpu.memory_space<vmem>>, vector<1x1xf32>
    %15 = vector.broadcast %14 : vector<1x1xf32> to vector<1x256xf32>
    %16 = arith.addf %13, %15 : vector<1x256xf32>
    %c0_11 = arith.constant 0 : index
    %c0_12 = arith.constant 0 : index
    %17 = vector.load %arg6[%c0_11, %c0_12] : memref<1x256xf32, #tpu.memory_space<vmem>>, vector<1x256xf32>
    tpu.vector_store %arg6[%c0_11, %c0_12], %16 {strides = array<i32>} : memref<1x256xf32, #tpu.memory_space<vmem>>, vector<1x256xf32>,
    return
  }
  func.func @transform_0(%arg0: i32) -> (i32, i32) {
    %c0_i32 = arith.constant 0 : i32
    %c0_i32_0 = arith.constant 0 : i32
    return %c0_i32, %arg0 : i32, i32
  }
  func.func @transform_1(%arg0: i32) -> (i32, i32) {
    %c0_i32 = arith.constant 0 : i32
    %c0_i32_0 = arith.constant 0 : i32
    %c0_i32_1 = arith.constant 0 : i32
    return %c0_i32, %c0_i32_0 : i32, i32
  }
  func.func @transform_2(%arg0: i32) -> (i32, i32) {
    %c0_i32 = arith.constant 0 : i32
    %c0_i32_0 = arith.constant 0 : i32
    %c0_i32_1 = arith.constant 0 : i32
    return %c0_i32, %c0_i32_0 : i32, i32
  }
  func.func @transform_3(%arg0: i32) -> (i32, i32) {
    %c0_i32 = arith.constant 0 : i32
    %c0_i32_0 = arith.constant 0 : i32
    %c0_i32_1 = arith.constant 0 : i32
    return %c0_i32, %c0_i32_0 : i32, i32
  }
  func.func @transform_4(%arg0: i32) -> (i32, i32) {
    %c0_i32 = arith.constant 0 : i32
    %c0_i32_0 = arith.constant 0 : i32
    %c0_i32_1 = arith.constant 0 : i32
    return %c0_i32, %c0_i32_0 : i32, i32
  }
  func.func @transform_5(%arg0: i32) -> (i32, i32) {
    %c0_i32 = arith.constant 0 : i32
    %c0_i32_0 = arith.constant 0 : i32
    return %c0_i32, %arg0 : i32, i32
  }
}

</mosaic_0001>

<bundles_post_ra>
// kernel: fno_forward.6
= control target key start
LH: loop header
LB: loop body
LE: loop exit
PB: predicated region body
PF: predicated region fallthrough
CT: control target
= control target key end

     0   :  { %s664_s18 = smov 0   ;;  %s857_s0 = inlined_call_operand.vmem [shape: f32[1,512], index: 0, kind: input, shape index: {}]   ;;  %s858_s1 = inlined_call_operand.vmem [shape: f32[32,1], index: 1, kind: input, shape index: {}]   ;;  %s859_s2 = inlined_call_operand.vmem [shape: f32[32,1], index: 2, kind: input, shape index: {}]   ;;  %s860_s3 = inlined_call_operand.vmem [shape: f32[8,32], index: 3, kind: input, shape index: {}]   ;;  %s861_s4 = inlined_call_operand.vmem [shape: f32[8,1], index: 4, kind: input, shape index: {}]   ;;  %s862_s5 = inlined_call_operand.vmem [shape: f32[8,512], index: 5, kind: output, shape index: {}]  }
   0x1 LB: > { %s561_s19 = sadd.s32 4294967295, %s631_s18   ;;  %p565_p0 = scmp.ge.s32.totalorder %s631_s18, 1  ;;  %s631_s18 = sphi %s664_s18, %s15_s18  }
   0x2   : > { %p187_p1 = scmp.lt.s32.totalorder %s631_s18, 3 }
   0x4   : > { %p188_p2 = pnand %p565_p0, %p187_p1 }
   0x5   : > { %s566_s13 = sshll.u32 (!%p188_p2), %s561_s19, 1 }
   0x6   : > { %191 = sbr.rel (%p188_p2) target bundleno = 312 (0x138), region = 40  ;;  %p215_p3 = scmp.lt.s32.totalorder (!%p188_p2), %s566_s13, 3 }
   0xb   : > { %v266_v0 = vld [vmem:[%s859_s2 + $0x18] sm:$0xff]  ;;  %v633_v2 = vmov 0   ;;  %v265_v3 = vld [vmem:[%s859_s2 + $0x10] sm:$0xff]  ;;  %v227_v5 = vld [vmem:[%s858_s1 + $0x8] sm:$0xff]  ;;  %s878_s13 = smov (!%p215_p3, %s566_s13), 3 }
   0xc   : > { %v229_v1 = vld [vmem:[%s858_s1 + $0x18] sm:$0xff]  ;;  %591 = vset.pattern.permute.xlu1 %v633_v2  ;;  %590 = vset.pattern.permute.xlu0 %v633_v2  ;;  %v228_v4 = vld [vmem:[%s858_s1 + $0x10] sm:$0xff]  ;;  %v226_v6 = vld [vmem:[%s858_s1] sm:$0xff]  ;;  %s217_s16 = scalar_lea.vmem %s857_s0, %s878_s13  ;;  %s568_s20 = sshll.u32 %s878_s13, 3 }
   0xd   : > { %284 = vperm.xlu1 %591, %v266_v0   ;;  %247 = vperm.xlu0 %590, %v229_v1   ;;  %v264_v7 = vld [vmem:[%s859_s2 + $0x8] sm:$0xff]  ;;  %v263_v8 = vld [vmem:[%s859_s2] sm:$0xff]  ;;  %s223_s23 = scalar_lea.vmem %s862_s5, %s568_s20 }
   0xe   : > { %592 = vset.pattern.permute.xlu2 %v633_v2  ;;  %v456_v9 = vld [vmem:[%s861_s4] sm:$0xff] }
   0xf   : > { %279 = vperm.xlu2 %592, %v265_v3   ;;  %v225_v10 = vld [vmem:[%s217_s16] sm:$0x3] }
  0x10   : > { %v251_v11 = vperm.slane %v225_v10, 0  ;;  %v252_v12 = vperm.slane %v225_v10, 1 }
  0x15   : > { %242 = vperm.xlu0 %590, %v228_v4   ;;  %237 = vperm.xlu1 %591, %v227_v5  }
  0x17   : > { %232 = vperm.xlu2 %592, %v226_v6  }
  0x1d   : > { %274 = vperm.xlu0 %590, %v264_v7   ;;  %269 = vperm.xlu1 %591, %v263_v8  }
  0x1f   : > { %459 = vperm.xlu2 %592, %v456_v9  }
  0x69   : > { %v280_v17 = vpop.permute.xlu2 %279 }
  0x71   : > { %v233_v29 = vpop.permute.xlu2 %232 }
  0x72   : > { %v255_v32 = vmul.f32 %v251_v11, %v233_v29  ;;  %v256_v33 = vmul.f32 %v252_v12, %v233_v29 }
  0x7f   : > { %v285_v13 = vpop.permute.xlu1 %284  ;;  %v248_v14 = vpop.permute.xlu0 %247 }
  0x80   : > { %v261_v15 = vmul.f32 %v251_v11, %v248_v14  ;;  %v262_v16 = vmul.f32 %v252_v12, %v248_v14 }
  0x82   : > { %v705_v18 = vadd.f32 %v285_v13, %v261_v15  ;;  %v707_v19 = vadd.f32 %v285_v13, %v262_v16 }
  0x84   : > { %v575_v20 = vmul.f32 -1.442695, %v705_v18  ;;  %v576_v21 = vmul.f32 -1.442695, %v707_v19 }
  0x86   : > { %593 = vpow2.f32 %v575_v20 }
  0x87   : > { %v243_v22 = vpop.permute.xlu0 %242  ;;  %v238_v23 = vpop.permute.xlu1 %237  ;;  %595 = vpow2.f32 %v576_v21 }
  0x88   : > { %v259_v24 = vmul.f32 %v251_v11, %v243_v22  ;;  %v260_v25 = vmul.f32 %v252_v12, %v243_v22  ;;  %v257_v34 = vmul.f32 %v251_v11, %v238_v23  ;;  %v258_v36 = vmul.f32 %v252_v12, %v238_v23 }
  0x8a   : > { %v711_v26 = vadd.f32 %v280_v17, %v259_v24  ;;  %v713_v27 = vadd.f32 %v280_v17, %v260_v25 }
  0x8c   : > { %v594_v28 = vpop.eup %593  ;;  %v573_v30 = vmul.f32 -1.442695, %v711_v26  ;;  %v574_v38 = vmul.f32 -1.442695, %v713_v27 }
  0x8d   : > { %v596_v31 = vpop.eup %595  ;;  %v325_v35 = vadd.f32 1.0, %v594_v28 }
  0x8e   : > { %v716_v37 = vadd.f32 1.0, %v596_v31  ;;  %597 = vpow2.f32 %v573_v30 }
  0x8f   : > { %v275_v39 = vpop.permute.xlu0 %274  ;;  %v270_v40 = vpop.permute.xlu1 %269  ;;  %599 = vrcp.f32 %v325_v35  ;;  %v426_v50 = vand.u32 2147483647, %v325_v35  ;;  %v428_v52 = vand.u32 2147483648, %v325_v35  ;;  %vm422_vm0 = vweird.f32 %v325_v35 }
  0x90   : > { %v719_v41 = vadd.f32 %v275_v39, %v257_v34  ;;  %v721_v42 = vadd.f32 %v275_v39, %v258_v36  ;;  %v723_v43 = vadd.f32 %v270_v40, %v255_v32  ;;  %v725_v44 = vadd.f32 %v270_v40, %v256_v33 }
  0x91   : > { %601 = vrcp.f32 %v716_v37  ;;  %v441_v53 = vand.u32 2147483647, %v716_v37  ;;  %v443_v56 = vand.u32 2147483648, %v716_v37  ;;  %vm736_vm1 = vcmp.eq.f32.partialorder %v426_v50, 8.507059e+37 }
  0x92   : > { %v571_v45 = vmul.f32 -1.442695, %v719_v41  ;;  %v572_v46 = vmul.f32 -1.442695, %v721_v42  ;;  %v569_v47 = vmul.f32 -1.442695, %v723_v43  ;;  %603 = vpow2.f32 %v574_v38 }
  0x93   : > { %v570_v48 = vmul.f32 -1.442695, %v725_v44  ;;  %v429_v62 = vor.u32 1.1754944e-38, %v428_v52  ;;  %vm437_vm2 = vweird.f32 %v716_v37  ;;  %vm743_vm3 = vcmp.eq.f32.partialorder %v441_v53, 8.507059e+37 }
  0x94   : > { %v598_v49 = vpop.eup %597  ;;  %605 = vpow2.f32 %v571_v45  ;;  %v444_v4 = vor.u32 1.1754944e-38, %v443_v56 }
  0x95   : > { %v600_v51 = vpop.eup %599  ;;  %607 = vpow2.f32 %v572_v46  ;;  %v733_v54 = vadd.f32 1.0, %v598_v49 }
  0x96   : > { %609 = vpow2.f32 %v569_v47  ;;  %v418_v55 = vmul.f32 %v600_v51, %v325_v35  ;;  %vm423_vm4 = vweird.f32 %v600_v51 }
  0x97   : > { %v602_v57 = vpop.eup %601  ;;  %611 = vpow2.f32 %v570_v48  ;;  %v396_v7 = vand.u32 2147483647, %v733_v54  ;;  %v398_v8 = vand.u32 2147483648, %v733_v54  ;;  %vm424_vm6 = vmor %vm422_vm0, %vm423_vm4  ;;  %vm392_vm7 = vweird.f32 %v733_v54 }
  0x98   : > { %v604_v58 = vpop.eup %603  ;;  %v419_v59 = vsub.f32 1.0, %v418_v55  ;;  %v433_v61 = vmul.f32 %v602_v57, %v716_v37  ;;  %613 = vrcp.f32 %v733_v54  ;;  %vm438_vm5 = vweird.f32 %v602_v57 }
  0x99   : > { %v747_v0 = vadd.f32 1.0, %v604_v58  ;;  %vm439_vm8 = vmor %vm437_vm2, %vm438_vm5  ;;  %vm774_vm9 = vcmp.eq.f32.partialorder %v396_v7, 8.507059e+37  ;;  %v399_v28 = vor.u32 1.1754944e-38, %v398_v8 }
  0x9a   : > { %v606_v1 = vpop.eup %605  ;;  %v420_v2 = vmul.f32 %v600_v51, %v419_v59  ;;  %v434_v3 = vsub.f32 1.0, %v433_v61 }
  0x9b   : > { %v608_v5 = vpop.eup %607  ;;  %v749_v6 = vadd.f32 1.0, %v606_v1  ;;  %615 = vrcp.f32 %v747_v0  ;;  %v411_v15 = vand.u32 2147483647, %v747_v0  ;;  %v413_v16 = vand.u32 2147483648, %v747_v0 }
  0x9c   : > { %v610_v9 = vpop.eup %609  ;;  %v754_v10 = vadd.f32 1.0, %v608_v5  ;;  %v421_v11 = vadd.f32 %v600_v51, %v420_v2  ;;  %v435_v12 = vmul.f32 %v602_v57, %v434_v3  ;;  %vm407_vm10 = vweird.f32 %v747_v0 }
  0x9d   : > { %v612_v13 = vpop.eup %611  ;;  %617 = vrcp.f32 %v749_v6  ;;  %v757_v14 = vadd.f32 1.0, %v610_v9  ;;  %v366_v34 = vand.u32 2147483647, %v749_v6  ;;  %v368_v35 = vand.u32 2147483648, %v749_v6 }
  0x9e   : > { %v614_v17 = vpop.eup %613  ;;  %619 = vrcp.f32 %v754_v10  ;;  %v765_v20 = vadd.f32 1.0, %v612_v13  ;;  %v425_v21 = vsel %vm424_vm6, %v600_v51, %v421_v11  ;;  %v436_v22 = vadd.f32 %v602_v57, %v435_v12 }
  0x9f   : > { %621 = vrcp.f32 %v757_v14  ;;  %v430_v23 = vsel %vm736_vm1, %v429_v62, %v425_v21  ;;  %v388_v24 = vmul.f32 %v614_v17, %v733_v54  ;;  %vm393_vm11 = vweird.f32 %v614_v17 }
  0xa0   : > { %623 = vrcp.f32 %v765_v20  ;;  %v453_v29 = vmul.f32 %v430_v23, %v705_v18  ;;  %v440_v30 = vsel %vm439_vm8, %v602_v57, %v436_v22  ;;  %vm787_vm12 = vcmp.eq.f32.partialorder %v411_v15, 8.507059e+37 }
  0xa1   : > { %v616_v31 = vpop.eup %615  ;;  %v445_v32 = vsel %vm743_vm3, %v444_v4, %v440_v30  ;;  %v389_v33 = vsub.f32 1.0, %v388_v24  ;;  %v414_v38 = vor.u32 1.1754944e-38, %v413_v16  ;;  %vm362_vm13 = vweird.f32 %v749_v6  ;;  %vm394_vm3 = vmor %vm392_vm7, %vm393_vm11 }
  0xa2   : > { %478 = vmatpush.msra.mxu0 %v453_v29  ;;  %v454_v36 = vmul.f32 %v445_v32, %v707_v19  ;;  %v403_v37 = vmul.f32 %v616_v31, %v747_v0  ;;  %vm408_vm14 = vweird.f32 %v616_v31  ;;  %vm377_vm15 = vweird.f32 %v754_v10 }
  0xa3   : > { %v618_v39 = vpop.eup %617  ;;  %v390_v40 = vmul.f32 %v614_v17, %v389_v33  ;;  %v381_v45 = vand.u32 2147483647, %v754_v10  ;;  %vm795_vm0 = vcmp.eq.f32.partialorder %v366_v34, 8.507059e+37  ;;  %v369_v49 = vor.u32 1.1754944e-38, %v368_v35  ;;  %vm409_vm6 = vmor %vm407_vm10, %vm408_vm14 }
  0xa4   : > { %v620_v46 = vpop.eup %619  ;;  %498 = vmatpush.msra.mxu1 %v454_v36  ;;  %v404_v19 = vsub.f32 1.0, %v403_v37  ;;  %v358_v47 = vmul.f32 %v618_v39, %v749_v6  ;;  %v383_v50 = vand.u32 2147483648, %v754_v10  ;;  %vm363_vm1 = vweird.f32 %v618_v39 }
  0xa5   : > { %v622_v51 = vpop.eup %621  ;;  %v391_v52 = vadd.f32 %v614_v17, %v390_v40  ;;  %v373_v53 = vmul.f32 %v620_v46, %v754_v10  ;;  %vm378_vm2 = vweird.f32 %v620_v46  ;;  %vm804_vm4 = vcmp.eq.f32.partialorder %v381_v45, 8.507059e+37  ;;  %vm364_vm7 = vmor %vm362_vm13, %vm363_vm1 }
  0xa6   : > { %v624_v55 = vpop.eup %623  ;;  %v405_v56 = vmul.f32 %v616_v31, %v404_v19  ;;  %v359_v57 = vsub.f32 1.0, %v358_v47  ;;  %v328_v59 = vmul.f32 %v622_v51, %v757_v14  ;;  %v384_v62 = vor.u32 1.1754944e-38, %v383_v50  ;;  %vm379_vm10 = vmor %vm377_vm15, %vm378_vm2 }
  0xa7   : > { %v395_v60 = vsel %vm394_vm3, %v614_v17, %v391_v52  ;;  %v374_v61 = vsub.f32 1.0, %v373_v53  ;;  %vm333_vm5 = vweird.f32 %v622_v51  ;;  %v336_v5 = vand.u32 2147483647, %v757_v14 }
  0xa8   : > { %v400_v63 = vsel %vm774_vm9, %v399_v28, %v395_v60  ;;  %v406_v1 = vadd.f32 %v616_v31, %v405_v56  ;;  %v360_v2 = vmul.f32 %v618_v39, %v359_v57  ;;  %v329_v3 = vsub.f32 1.0, %v328_v59 }
  0xa9   : > { %v451_v54 = vmul.f32 %v400_v63, %v711_v26  ;;  %v375_v4 = vmul.f32 %v620_v46, %v374_v61  ;;  %v338_v7 = vand.u32 2147483648, %v757_v14  ;;  %v343_v12 = vmul.f32 %v624_v55, %v765_v20 }
  0xaa   : > { %v410_v8 = vsel %vm409_vm6, %v616_v31, %v406_v1  ;;  %v361_v9 = vadd.f32 %v618_v39, %v360_v2  ;;  %v330_v11 = vmul.f32 %v622_v51, %v329_v3  ;;  %vm332_vm8 = vweird.f32 %v757_v14 }
  0xab   : > { %479 = vmatpush.msra.mxu0 %v451_v54  ;;  %v415_v13 = vsel %vm787_vm12, %v414_v38, %v410_v8  ;;  %v376_v26 = vadd.f32 %v620_v46, %v375_v4  ;;  %vm824_vm9 = vcmp.eq.f32.partialorder %v336_v5, 8.507059e+37  ;;  %v344_v21 = vsub.f32 1.0, %v343_v12  ;;  %vm334_vm11 = vmor %vm332_vm8, %vm333_vm5 }
  0xac   : > { %v452_v15 = vmul.f32 %v415_v13, %v713_v27  ;;  %v365_v16 = vsel %vm364_vm7, %v618_v39, %v361_v9  ;;  %v331_v17 = vadd.f32 %v622_v51, %v330_v11  ;;  %v339_v14 = vor.u32 1.1754944e-38, %v338_v7 }
  0xad   : > { %v370_v6 = vsel %vm795_vm0, %v369_v49, %v365_v16  ;;  %v380_v22 = vsel %vm379_vm10, %v620_v46, %v376_v26  ;;  %vm348_vm12 = vweird.f32 %v624_v55  ;;  %v345_v25 = vmul.f32 %v624_v55, %v344_v21 }
  0xae   : > { %499 = vmatpush.msra.mxu1 %v452_v15  ;;  %v449_v23 = vmul.f32 %v370_v6, %v719_v41  ;;  %v385_v27 = vsel %vm804_vm4, %v384_v62, %v380_v22  ;;  %v335_v24 = vsel %vm334_vm11, %v622_v51, %v331_v17  ;;  %v351_v29 = vand.u32 2147483647, %v765_v20  ;;  %v455_v41 = vld [vmem:[%s860_s3] sm:$0xff] }
  0xaf   : > { %v450_v10 = vmul.f32 %v385_v27, %v721_v42  ;;  %v340_v28 = vsel %vm824_vm9, %v339_v14, %v335_v24  ;;  %v353_v30 = vand.u32 2147483648, %v765_v20  ;;  %v346_v32 = vadd.f32 %v624_v55, %v345_v25 }
  0xb0   : > { %480 = vmatpush.msra.mxu0 %v449_v23  ;;  %v447_v31 = vmul.f32 %v340_v28, %v723_v43  ;;  %vm347_vm13 = vweird.f32 %v765_v20  ;;  %vm462_vm14 = vcmask 261120   ;;  %vm352_vm0 = vcmp.eq.f32.partialorder %v351_v29, 8.507059e+37  ;;  %v460_v20 = vpop.permute.xlu2 %459 }
  0xb1   : > { %500 = vmatpush.msra.mxu1 %v450_v10  ;;  %vm349_vm15 = vmor %vm347_vm13, %vm348_vm12  ;;  %v354_v42 = vor.u32 1.1754944e-38, %v353_v30 }
  0xb2   : > { %481 = vmatpush.msra.mxu0 %v447_v31  ;;  %v350_v33 = vsel %vm349_vm15, %v624_v55, %v346_v32 }
  0xb3   : > { %v355_v34 = vsel %vm352_vm0, %v354_v42, %v350_v33  ;;  %577 = vmatmul.msk.f32.vlgmr.msra.gmra.mxu0 %vm462_vm14, %v455_v41 }
  0xb4   : > { %v448_v43 = vmul.f32 %v355_v34, %v725_v44 }
  0xb6   : > { %501 = vmatpush.msra.mxu1 %v448_v43 }
  0xb7   : > { %578 = vmatmul.msk.f32.vlgmr.msra.gmra.mxu1 %vm462_vm14, %v455_v41 }
 0x130   : > { %v483_v35 = vpop.f32.mrf.mxu0 }
 0x131   : > { %v484_v36 = vadd.f32 %v483_v35, %v460_v20 }
 0x133   : > { %506 = vst [vmem:[%s223_s23] sm:$0xff] %v484_v36 }
 0x134   : > { %v503_v37 = vpop.f32.mrf.mxu1 }
 0x135   : > { %v504_v18 = vadd.f32 %v503_v37, %v460_v20 }
 0x137   : > { %507 = vst [vmem:[%s223_s23 + $0x8] sm:$0xff] %v504_v18 }
 0x138 PF: > { %s15_s18 = sadd.s32 1, %s631_s18  }
 0x139   : > { %p12_p4 = scmp.ge.s32.totalorder %s15_s18, 4  }
 0x13b   :  { %14 = sbr.rel (!%p12_p4) target bundleno = 1 (0x1), region = 70 }

// kernel: fno_forward.7
= control target key start
LH: loop header
LB: loop body
LE: loop exit
PB: predicated region body
PF: predicated region fallthrough
CT: control target
= control target key end

     0   :  { %vm107_vm0 = vcmask 130048   ;;  %vm844_vm1 = vcmask 123904   ;;  %s1376_s1 = inlined_call_operand.vmem [shape: f32[32,16,16], index: 1, kind: input, shape index: {}]   ;;  %s1377_s0 = inlined_call_operand.vmem [shape: f32[32,2,16], index: 0, kind: input, shape index: {}]   ;;  %s1378_s2 = inlined_call_operand.vmem [shape: f32[32,2,16], index: 2, kind: output, shape index: {}]  }
   0x1   :  { %v48_v0 = vld [vmem:[%s1376_s1 + $0x28] sm:$0xff]  ;;  %v50_v1 = vld [vmem:[%s1376_s1 + $0x38] sm:$0xff]  ;;  %v47_v2 = vld [vmem:[%s1376_s1 + $0x20] sm:$0xff] }
   0x2   :  { %171 = vmatpush.msra.mxu2 %v48_v0  ;;  %194 = vmatpush.msra.mxu3 %v50_v1  ;;  %v49_v3 = vld [vmem:[%s1376_s1 + $0x30] sm:$0xff]  ;;  %v13_v4 = vld [vmem:[%s1377_s0 + $0x4] sm:$0x3]  ;;  %v14_v5 = vld [vmem:[%s1377_s0 + $0x6] sm:$0x3] }
   0x3   :  { %v56_v6 = vld [vmem:[%s1376_s1 + $0x68] sm:$0xff]  ;;  %v58_v7 = vld [vmem:[%s1376_s1 + $0x78] sm:$0xff]  ;;  %v55_v10 = vld [vmem:[%s1376_s1 + $0x60] sm:$0xff] }
   0x4   :  { %172 = vmatpush.msra.mxu2 %v47_v2  ;;  %195 = vmatpush.msra.mxu3 %v49_v3  ;;  %v44_v8 = vld [vmem:[%s1376_s1 + $0x8] sm:$0xff]  ;;  %v46_v9 = vld [vmem:[%s1376_s1 + $0x18] sm:$0xff]  ;;  %v57_v11 = vld [vmem:[%s1376_s1 + $0x70] sm:$0xff] }
   0x5   :  { %883 = vmatmul.msk.f32.vlgmr.msra.gmra.mxu2 %vm107_vm0, %v13_v4  ;;  %884 = vmatmul.msk.f32.vlgmr.msra.gmra.mxu3 %vm107_vm0, %v14_v5  ;;  %v43_v12 = vld [vmem:[%s1376_s1] sm:$0xff]  ;;  %v45_v13 = vld [vmem:[%s1376_s1 + $0x10] sm:$0xff]  ;;  %v52_v16 = vld [vmem:[%s1376_s1 + $0x48] sm:$0xff] }
   0x6   :  { %263 = vmatpush.msrb.mxu2 %v56_v6  ;;  %286 = vmatpush.msrb.mxu3 %v58_v7  ;;  %v11_v14 = vld [vmem:[%s1377_s0] sm:$0x3]  ;;  %v12_v15 = vld [vmem:[%s1377_s0 + $0x2] sm:$0x3]  ;;  %v54_v17 = vld [vmem:[%s1376_s1 + $0x58] sm:$0xff] }
   0x7   :  { %125 = vmatpush.msra.mxu0 %v44_v8  ;;  %148 = vmatpush.msra.mxu1 %v46_v9  ;;  %v64_v18 = vld [vmem:[%s1376_s1 + $0xa8] sm:$0xff]  ;;  %v66_v19 = vld [vmem:[%s1376_s1 + $0xb8] sm:$0xff]  ;;  %v51_v22 = vld [vmem:[%s1376_s1 + $0x40] sm:$0xff] }
   0x8   :  { %264 = vmatpush.msrb.mxu2 %v55_v10  ;;  %287 = vmatpush.msrb.mxu3 %v57_v11  ;;  %v17_v20 = vld [vmem:[%s1377_s0 + $0xc] sm:$0x3]  ;;  %v18_v21 = vld [vmem:[%s1377_s0 + $0xe] sm:$0x3]  ;;  %v53_v23 = vld [vmem:[%s1376_s1 + $0x50] sm:$0xff] }
   0x9   :  { %126 = vmatpush.msra.mxu0 %v43_v12  ;;  %149 = vmatpush.msra.mxu1 %v45_v13  ;;  %v63_v24 = vld [vmem:[%s1376_s1 + $0xa0] sm:$0xff]  ;;  %v65_v25 = vld [vmem:[%s1376_s1 + $0xb0] sm:$0xff]  ;;  %v60_v26 = vld [vmem:[%s1376_s1 + $0x88] sm:$0xff] }
   0xa   :  { %881 = vmatmul.msk.f32.vlgmr.msra.gmra.mxu0 %vm107_vm0, %v11_v14  ;;  %882 = vmatmul.msk.f32.vlgmr.msra.gmra.mxu1 %vm107_vm0, %v12_v15  ;;  %v62_v27 = vld [vmem:[%s1376_s1 + $0x98] sm:$0xff]  ;;  %v72_v28 = vld [vmem:[%s1376_s1 + $0xe8] sm:$0xff]  ;;  %v59_v32 = vld [vmem:[%s1376_s1 + $0x80] sm:$0xff] }
   0xb   :  { %217 = vmatpush.msrb.mxu0 %v52_v16  ;;  %240 = vmatpush.msrb.mxu1 %v54_v17  ;;  %v74_v29 = vld [vmem:[%s1376_s1 + $0xf8] sm:$0xff]  ;;  %v15_v30 = vld [vmem:[%s1377_s0 + $0x8] sm:$0x3]  ;;  %v16_v31 = vld [vmem:[%s1377_s0 + $0xa] sm:$0x3] }
   0xc   :  { %355 = vmatpush.msra.mxu2 %v64_v18  ;;  %378 = vmatpush.msra.mxu3 %v66_v19  ;;  %v61_v33 = vld [vmem:[%s1376_s1 + $0x90] sm:$0xff]  ;;  %v71_v34 = vld [vmem:[%s1376_s1 + $0xe0] sm:$0xff]  ;;  %v68_v38 = vld [vmem:[%s1376_s1 + $0xc8] sm:$0xff] }
   0xd   :  { %887 = vmatmul.msk.f32.vlgmr.msrb.gmra.mxu2 %vm107_vm0, %v17_v20  ;;  %888 = vmatmul.msk.f32.vlgmr.msrb.gmra.mxu3 %vm107_vm0, %v18_v21  ;;  %v73_v35 = vld [vmem:[%s1376_s1 + $0xf0] sm:$0xff]  ;;  %v70_v39 = vld [vmem:[%s1376_s1 + $0xd8] sm:$0xff]  ;;  %v80_v40 = vld [vmem:[%s1376_s1 + $0x128] sm:$0xff] }
   0xe   :  { %218 = vmatpush.msrb.mxu0 %v51_v22  ;;  %241 = vmatpush.msrb.mxu1 %v53_v23  ;;  %v21_v36 = vld [vmem:[%s1377_s0 + $0x14] sm:$0x3]  ;;  %v22_v37 = vld [vmem:[%s1377_s0 + $0x16] sm:$0x3]  ;;  %v82_v41 = vld [vmem:[%s1376_s1 + $0x138] sm:$0xff] }
   0xf   :  { %356 = vmatpush.msra.mxu2 %v63_v24  ;;  %379 = vmatpush.msra.mxu3 %v65_v25  ;;  %v67_v42 = vld [vmem:[%s1376_s1 + $0xc0] sm:$0xff]  ;;  %v69_v43 = vld [vmem:[%s1376_s1 + $0xd0] sm:$0xff]  ;;  %v76_v48 = vld [vmem:[%s1376_s1 + $0x108] sm:$0xff] }
  0x10   :  { %309 = vmatpush.msra.mxu0 %v60_v26  ;;  %332 = vmatpush.msra.mxu1 %v62_v27  ;;  %v79_v44 = vld [vmem:[%s1376_s1 + $0x120] sm:$0xff]  ;;  %v81_v45 = vld [vmem:[%s1376_s1 + $0x130] sm:$0xff]  ;;  %v78_v49 = vld [vmem:[%s1376_s1 + $0x118] sm:$0xff] }
  0x11   :  { %447 = vmatpush.msrb.mxu2 %v72_v28  ;;  %470 = vmatpush.msrb.mxu3 %v74_v29  ;;  %v19_v46 = vld [vmem:[%s1377_s0 + $0x10] sm:$0x3]  ;;  %v20_v47 = vld [vmem:[%s1377_s0 + $0x12] sm:$0x3]  ;;  %v25_v50 = vld [vmem:[%s1377_s0 + $0x1c] sm:$0x3] }
  0x12   :  { %885 = vmatmul.msk.f32.vlgmr.msrb.gmra.mxu0 %vm107_vm0, %v15_v30  ;;  %886 = vmatmul.msk.f32.vlgmr.msrb.gmra.mxu1 %vm107_vm0, %v16_v31  ;;  %v26_v51 = vld [vmem:[%s1377_s0 + $0x1e] sm:$0x3]  ;;  %v88_v52 = vld [vmem:[%s1376_s1 + $0x168] sm:$0xff]  ;;  %v75_v54 = vld [vmem:[%s1376_s1 + $0x100] sm:$0xff] }
  0x13   :  { %310 = vmatpush.msra.mxu0 %v59_v32  ;;  %333 = vmatpush.msra.mxu1 %v61_v33  ;;  %v90_v53 = vld [vmem:[%s1376_s1 + $0x178] sm:$0xff]  ;;  %v77_v55 = vld [vmem:[%s1376_s1 + $0x110] sm:$0xff]  ;;  %v87_v56 = vld [vmem:[%s1376_s1 + $0x160] sm:$0xff] }
  0x14   :  { %448 = vmatpush.msrb.mxu2 %v71_v34  ;;  %471 = vmatpush.msrb.mxu3 %v73_v35  ;;  %v89_v57 = vld [vmem:[%s1376_s1 + $0x170] sm:$0xff]  ;;  %v23_v58 = vld [vmem:[%s1377_s0 + $0x18] sm:$0x3]  ;;  %v24_v59 = vld [vmem:[%s1377_s0 + $0x1a] sm:$0x3] }
  0x15   :  { %891 = vmatmul.msk.f32.vlgmr.msra.gmra.mxu2 %vm107_vm0, %v21_v36  ;;  %892 = vmatmul.msk.f32.vlgmr.msra.gmra.mxu3 %vm107_vm0, %v22_v37  ;;  %v84_v60 = vld [vmem:[%s1376_s1 + $0x148] sm:$0xff]  ;;  %v86_v61 = vld [vmem:[%s1376_s1 + $0x158] sm:$0xff]  ;;  %v29_v62 = vld [vmem:[%s1377_s0 + $0x24] sm:$0x3] }
  0x16   :  { %401 = vmatpush.msrb.mxu0 %v68_v38  ;;  %424 = vmatpush.msrb.mxu1 %v70_v39  ;;  %v30_v63 = vld [vmem:[%s1377_s0 + $0x26] sm:$0x3]  ;;  %v96_v0 = vld [vmem:[%s1376_s1 + $0x1a8] sm:$0xff]  ;;  %v98_v1 = vld [vmem:[%s1376_s1 + $0x1b8] sm:$0xff] }
  0x17   :  { %539 = vmatpush.msra.mxu2 %v80_v40  ;;  %562 = vmatpush.msra.mxu3 %v82_v41  ;;  %v83_v2 = vld [vmem:[%s1376_s1 + $0x140] sm:$0xff]  ;;  %v85_v3 = vld [vmem:[%s1376_s1 + $0x150] sm:$0xff]  ;;  %v92_v8 = vld [vmem:[%s1376_s1 + $0x188] sm:$0xff] }
  0x18   :  { %402 = vmatpush.msrb.mxu0 %v67_v42  ;;  %425 = vmatpush.msrb.mxu1 %v69_v43  ;;  %v95_v4 = vld [vmem:[%s1376_s1 + $0x1a0] sm:$0xff]  ;;  %v97_v5 = vld [vmem:[%s1376_s1 + $0x1b0] sm:$0xff]  ;;  %v94_v9 = vld [vmem:[%s1376_s1 + $0x198] sm:$0xff] }
  0x19   :  { %540 = vmatpush.msra.mxu2 %v79_v44  ;;  %563 = vmatpush.msra.mxu3 %v81_v45  ;;  %v27_v6 = vld [vmem:[%s1377_s0 + $0x20] sm:$0x3]  ;;  %v28_v7 = vld [vmem:[%s1377_s0 + $0x22] sm:$0x3]  ;;  %v33_v10 = vld [vmem:[%s1377_s0 + $0x2c] sm:$0x3] }
  0x1a   :  { %889 = vmatmul.msk.f32.vlgmr.msra.gmra.mxu0 %vm107_vm0, %v19_v46  ;;  %890 = vmatmul.msk.f32.vlgmr.msra.gmra.mxu1 %vm107_vm0, %v20_v47  ;;  %v34_v11 = vld [vmem:[%s1377_s0 + $0x2e] sm:$0x3]  ;;  %v106_v13 = vld [vmem:[%s1376_s1 + $0x1f8] sm:$0xff]  ;;  %v91_v14 = vld [vmem:[%s1376_s1 + $0x180] sm:$0xff] }
  0x1b   :  { %493 = vmatpush.msra.mxu0 %v76_v48  ;;  %516 = vmatpush.msra.mxu1 %v78_v49  ;;  %v104_v12 = vld [vmem:[%s1376_s1 + $0x1e8] sm:$0xff]  ;;  %v93_v15 = vld [vmem:[%s1376_s1 + $0x190] sm:$0xff]  ;;  %v103_v16 = vld [vmem:[%s1376_s1 + $0x1e0] sm:$0xff] }
  0x1c   :  { %v105_v17 = vld [vmem:[%s1376_s1 + $0x1f0] sm:$0xff]  ;;  %v31_v18 = vld [vmem:[%s1377_s0 + $0x28] sm:$0x3]  ;;  %v32_v19 = vld [vmem:[%s1377_s0 + $0x2a] sm:$0x3] }
  0x1d   :  { %895 = vmatmul.msk.f32.vlgmr.msrb.gmra.mxu2 %vm107_vm0, %v25_v50  ;;  %896 = vmatmul.msk.f32.vlgmr.msrb.gmra.mxu3 %vm107_vm0, %v26_v51  ;;  %v100_v20 = vld [vmem:[%s1376_s1 + $0x1c8] sm:$0xff]  ;;  %v102_v21 = vld [vmem:[%s1376_s1 + $0x1d8] sm:$0xff]  ;;  %v37_v22 = vld [vmem:[%s1377_s0 + $0x34] sm:$0x3] }
  0x1e   :  { %631 = vmatpush.msrb.mxu2 %v88_v52  ;;  %654 = vmatpush.msrb.mxu3 %v90_v53  ;;  %v38_v23 = vld [vmem:[%s1377_s0 + $0x36] sm:$0x3]  ;;  %v99_v24 = vld [vmem:[%s1376_s1 + $0x1c0] sm:$0xff]  ;;  %v35_v26 = vld [vmem:[%s1377_s0 + $0x30] sm:$0x3] }
  0x1f   :  { %494 = vmatpush.msra.mxu0 %v75_v54  ;;  %517 = vmatpush.msra.mxu1 %v77_v55  ;;  %v101_v25 = vld [vmem:[%s1376_s1 + $0x1d0] sm:$0xff]  ;;  %v41_v28 = vld [vmem:[%s1377_s0 + $0x3c] sm:$0x3]  ;;  %v42_v29 = vld [vmem:[%s1377_s0 + $0x3e] sm:$0x3] }
  0x20   :  { %632 = vmatpush.msrb.mxu2 %v87_v56  ;;  %655 = vmatpush.msrb.mxu3 %v89_v57  ;;  %v36_v27 = vld [vmem:[%s1377_s0 + $0x32] sm:$0x3]  ;;  %v39_v30 = vld [vmem:[%s1377_s0 + $0x38] sm:$0x3]  ;;  %v40_v31 = vld [vmem:[%s1377_s0 + $0x3a] sm:$0x3] }
  0x22   :  { %893 = vmatmul.msk.f32.vlgmr.msrb.gmra.mxu0 %vm107_vm0, %v23_v58  ;;  %894 = vmatmul.msk.f32.vlgmr.msrb.gmra.mxu1 %vm107_vm0, %v24_v59 }
  0x23   :  { %585 = vmatpush.msrb.mxu0 %v84_v60  ;;  %608 = vmatpush.msrb.mxu1 %v86_v61 }
  0x25   :  { %899 = vmatmul.msk.f32.vlgmr.msra.gmra.mxu2 %vm107_vm0, %v29_v62  ;;  %900 = vmatmul.msk.f32.vlgmr.msra.gmra.mxu3 %vm107_vm0, %v30_v63 }
  0x26   :  { %723 = vmatpush.msra.mxu2 %v96_v0  ;;  %746 = vmatpush.msra.mxu3 %v98_v1 }
  0x27   :  { %586 = vmatpush.msrb.mxu0 %v83_v2  ;;  %609 = vmatpush.msrb.mxu1 %v85_v3 }
  0x28   :  { %724 = vmatpush.msra.mxu2 %v95_v4  ;;  %747 = vmatpush.msra.mxu3 %v97_v5 }
  0x2a   :  { %897 = vmatmul.msk.f32.vlgmr.msra.gmra.mxu0 %vm107_vm0, %v27_v6  ;;  %898 = vmatmul.msk.f32.vlgmr.msra.gmra.mxu1 %vm107_vm0, %v28_v7 }
  0x2b   :  { %677 = vmatpush.msra.mxu0 %v92_v8  ;;  %700 = vmatpush.msra.mxu1 %v94_v9 }
  0x2d   :  { %903 = vmatmul.msk.f32.vlgmr.msrb.gmra.mxu2 %vm107_vm0, %v33_v10  ;;  %904 = vmatmul.msk.f32.vlgmr.msrb.gmra.mxu3 %vm107_vm0, %v34_v11 }
  0x2e   :  { %815 = vmatpush.msrb.mxu2 %v104_v12  ;;  %838 = vmatpush.msrb.mxu3 %v106_v13 }
  0x2f   :  { %678 = vmatpush.msra.mxu0 %v91_v14  ;;  %701 = vmatpush.msra.mxu1 %v93_v15 }
  0x30   :  { %816 = vmatpush.msrb.mxu2 %v103_v16  ;;  %839 = vmatpush.msrb.mxu3 %v105_v17 }
  0x32   :  { %901 = vmatmul.msk.f32.vlgmr.msrb.gmra.mxu0 %vm107_vm0, %v31_v18  ;;  %902 = vmatmul.msk.f32.vlgmr.msrb.gmra.mxu1 %vm107_vm0, %v32_v19 }
  0x33   :  { %769 = vmatpush.msrb.mxu0 %v100_v20  ;;  %792 = vmatpush.msrb.mxu1 %v102_v21 }
  0x35   :  { %907 = vmatmul.msk.f32.vlgmr.msra.gmra.mxu2 %vm107_vm0, %v37_v22  ;;  %908 = vmatmul.msk.f32.vlgmr.msra.gmra.mxu3 %vm107_vm0, %v38_v23 }
  0x36   :  { %770 = vmatpush.msrb.mxu0 %v99_v24  ;;  %793 = vmatpush.msrb.mxu1 %v101_v25 }
  0x3a   :  { %905 = vmatmul.msk.f32.vlgmr.msra.gmra.mxu0 %vm107_vm0, %v35_v26  ;;  %906 = vmatmul.msk.f32.vlgmr.msra.gmra.mxu1 %vm107_vm0, %v36_v27 }
  0x3d   :  { %911 = vmatmul.msk.f32.vlgmr.msrb.gmra.mxu2 %vm107_vm0, %v41_v28  ;;  %912 = vmatmul.msk.f32.vlgmr.msrb.gmra.mxu3 %vm107_vm0, %v42_v29 }
  0x42   :  { %909 = vmatmul.msk.f32.vlgmr.msrb.gmra.mxu0 %vm107_vm0, %v39_v30  ;;  %910 = vmatmul.msk.f32.vlgmr.msrb.gmra.mxu1 %vm107_vm0, %v40_v31 }
  0x87   :  { %v128_v32 = vpop.f32.mrf.mxu0  ;;  %v151_v33 = vpop.f32.mrf.mxu1 }
  0x88   :  { %845 = vst.msk [vmem:[%s1378_s2] sm:$0x3] %vm844_vm1, %v128_v32  ;;  %v174_v34 = vpop.f32.mrf.mxu2  ;;  %v197_v35 = vpop.f32.mrf.mxu3 }
  0x89   :  { %846 = vst.msk [vmem:[%s1378_s2 + $0x2] sm:$0x3] %vm844_vm1, %v151_v33 }
  0x8a   :  { %847 = vst.msk [vmem:[%s1378_s2 + $0x4] sm:$0x3] %vm844_vm1, %v174_v34 }
  0x8b   :  { %848 = vst.msk [vmem:[%s1378_s2 + $0x6] sm:$0x3] %vm844_vm1, %v197_v35 }
  0x8f   :  { %v220_v36 = vpop.f32.mrf.mxu0  ;;  %v243_v37 = vpop.f32.mrf.mxu1 }
  0x90   :  { %849 = vst.msk [vmem:[%s1378_s2 + $0x8] sm:$0x3] %vm844_vm1, %v220_v36  ;;  %v266_v38 = vpop.f32.mrf.mxu2  ;;  %v289_v39 = vpop.f32.mrf.mxu3 }
  0x91   :  { %850 = vst.msk [vmem:[%s1378_s2 + $0xa] sm:$0x3] %vm844_vm1, %v243_v37 }
  0x92   :  { %851 = vst.msk [vmem:[%s1378_s2 + $0xc] sm:$0x3] %vm844_vm1, %v266_v38 }
  0x93   :  { %852 = vst.msk [vmem:[%s1378_s2 + $0xe] sm:$0x3] %vm844_vm1, %v289_v39 }
  0x97   :  { %v312_v40 = vpop.f32.mrf.mxu0  ;;  %v335_v41 = vpop.f32.mrf.mxu1 }
  0x98   :  { %853 = vst.msk [vmem:[%s1378_s2 + $0x10] sm:$0x3] %vm844_vm1, %v312_v40  ;;  %v358_v42 = vpop.f32.mrf.mxu2  ;;  %v381_v43 = vpop.f32.mrf.mxu3 }
  0x99   :  { %854 = vst.msk [vmem:[%s1378_s2 + $0x12] sm:$0x3] %vm844_vm1, %v335_v41 }
  0x9a   :  { %855 = vst.msk [vmem:[%s1378_s2 + $0x14] sm:$0x3] %vm844_vm1, %v358_v42 }
  0x9b   :  { %856 = vst.msk [vmem:[%s1378_s2 + $0x16] sm:$0x3] %vm844_vm1, %v381_v43 }
  0x9f   :  { %v404_v44 = vpop.f32.mrf.mxu0  ;;  %v427_v45 = vpop.f32.mrf.mxu1 }
  0xa0   :  { %857 = vst.msk [vmem:[%s1378_s2 + $0x18] sm:$0x3] %vm844_vm1, %v404_v44  ;;  %v450_v46 = vpop.f32.mrf.mxu2  ;;  %v473_v47 = vpop.f32.mrf.mxu3 }
  0xa1   :  { %858 = vst.msk [vmem:[%s1378_s2 + $0x1a] sm:$0x3] %vm844_vm1, %v427_v45 }
  0xa2   :  { %859 = vst.msk [vmem:[%s1378_s2 + $0x1c] sm:$0x3] %vm844_vm1, %v450_v46 }
  0xa3   :  { %860 = vst.msk [vmem:[%s1378_s2 + $0x1e] sm:$0x3] %vm844_vm1, %v473_v47 }
  0xa7   :  { %v496_v48 = vpop.f32.mrf.mxu0  ;;  %v519_v49 = vpop.f32.mrf.mxu1 }
  0xa8   :  { %861 = vst.msk [vmem:[%s1378_s2 + $0x20] sm:$0x3] %vm844_vm1, %v496_v48  ;;  %v542_v50 = vpop.f32.mrf.mxu2  ;;  %v565_v51 = vpop.f32.mrf.mxu3 }
  0xa9   :  { %862 = vst.msk [vmem:[%s1378_s2 + $0x22] sm:$0x3] %vm844_vm1, %v519_v49 }
  0xaa   :  { %863 = vst.msk [vmem:[%s1378_s2 + $0x24] sm:$0x3] %vm844_vm1, %v542_v50 }
  0xab   :  { %864 = vst.msk [vmem:[%s1378_s2 + $0x26] sm:$0x3] %vm844_vm1, %v565_v51 }
  0xaf   :  { %v588_v52 = vpop.f32.mrf.mxu0  ;;  %v611_v53 = vpop.f32.mrf.mxu1 }
  0xb0   :  { %865 = vst.msk [vmem:[%s1378_s2 + $0x28] sm:$0x3] %vm844_vm1, %v588_v52  ;;  %v634_v54 = vpop.f32.mrf.mxu2  ;;  %v657_v55 = vpop.f32.mrf.mxu3 }
  0xb1   :  { %866 = vst.msk [vmem:[%s1378_s2 + $0x2a] sm:$0x3] %vm844_vm1, %v611_v53 }
  0xb2   :  { %867 = vst.msk [vmem:[%s1378_s2 + $0x2c] sm:$0x3] %vm844_vm1, %v634_v54 }
  0xb3   :  { %868 = vst.msk [vmem:[%s1378_s2 + $0x2e] sm:$0x3] %vm844_vm1, %v657_v55 }
  0xb7   :  { %v680_v56 = vpop.f32.mrf.mxu0  ;;  %v703_v57 = vpop.f32.mrf.mxu1 }
  0xb8   :  { %869 = vst.msk [vmem:[%s1378_s2 + $0x30] sm:$0x3] %vm844_vm1, %v680_v56  ;;  %v726_v58 = vpop.f32.mrf.mxu2  ;;  %v749_v59 = vpop.f32.mrf.mxu3 }
  0xb9   :  { %870 = vst.msk [vmem:[%s1378_s2 + $0x32] sm:$0x3] %vm844_vm1, %v703_v57 }
  0xba   :  { %871 = vst.msk [vmem:[%s1378_s2 + $0x34] sm:$0x3] %vm844_vm1, %v726_v58 }
  0xbb   :  { %872 = vst.msk [vmem:[%s1378_s2 + $0x36] sm:$0x3] %vm844_vm1, %v749_v59 }
  0xbf   :  { %v772_v60 = vpop.f32.mrf.mxu0  ;;  %v795_v61 = vpop.f32.mrf.mxu1 }
  0xc0   :  { %873 = vst.msk [vmem:[%s1378_s2 + $0x38] sm:$0x3] %vm844_vm1, %v772_v60  ;;  %v818_v62 = vpop.f32.mrf.mxu2  ;;  %v841_v63 = vpop.f32.mrf.mxu3 }
  0xc1   :  { %874 = vst.msk [vmem:[%s1378_s2 + $0x3a] sm:$0x3] %vm844_vm1, %v795_v61 }
  0xc2   :  { %875 = vst.msk [vmem:[%s1378_s2 + $0x3c] sm:$0x3] %vm844_vm1, %v818_v62 }
  0xc3   :  { %876 = vst.msk [vmem:[%s1378_s2 + $0x3e] sm:$0x3] %vm844_vm1, %v841_v63 }

// kernel: reverse.5
= control target key start
LH: loop header
LB: loop body
LE: loop exit
PB: predicated region body
PF: predicated region fallthrough
CT: control target
= control target key end

     0   :  { %v104_v10 = vlaneseq  ;;  %v97_v14 = vld [vmem:[#allocation0 + $0x7] ss:$-1 sm:$0xff]  ;;  %v111_v19 = vld [vmem:[#allocation0 + $0x17] ss:$-1 sm:$0xff]  ;;  %s606_s0 = inlined_call_operand.vmem [shape: f32[8,2,16,7], index: 0, kind: input, shape index: {}]   ;;  %s607_s1 = inlined_call_operand.vmem [shape: f32[8,2,16,7], index: 1, kind: output, shape index: {}]  }
   0x1   :  { %v61_v0 = vld [vmem:[%s606_s0] sm:$0xff]  ;;  %v63_v1 = vld [vmem:[%s606_s0 + $0x8] sm:$0xff]  ;;  %v65_v2 = vld [vmem:[%s606_s0 + $0x10] sm:$0xff]  ;;  %v98_v21 = vrot.slane %v97_v14, 1  ;;  %v112_v25 = vrot.slane %v111_v19, 1 }
   0x2   :  { %62 = vst [vmem:[#allocation0 + $0x8] sm:$0xff] %v61_v0  ;;  %v67_v3 = vld [vmem:[%s606_s0 + $0x18] sm:$0xff]  ;;  %v69_v4 = vld [vmem:[%s606_s0 + $0x20] sm:$0xff]  ;;  %v71_v5 = vld [vmem:[%s606_s0 + $0x28] sm:$0xff]  ;;  %v517_v17 = vshrl.u32 %v104_v10, 7 }
   0x3   :  { %64 = vst [vmem:[#allocation0 + $0x18] sm:$0xff] %v63_v1  ;;  %v73_v6 = vld [vmem:[%s606_s0 + $0x30] sm:$0xff]  ;;  %v75_v7 = vld [vmem:[%s606_s0 + $0x38] sm:$0xff]  ;;  %v77_v8 = vld [vmem:[%s606_s0 + $0x40] sm:$0xff] }
   0x4   :  { %66 = vst [vmem:[#allocation0 + $0x28] sm:$0xff] %v65_v2  ;;  %v79_v9 = vld [vmem:[%s606_s0 + $0x48] sm:$0xff]  ;;  %v81_v11 = vld [vmem:[%s606_s0 + $0x50] sm:$0xff]  ;;  %v83_v12 = vld [vmem:[%s606_s0 + $0x58] sm:$0xff]  ;;  %vm106_vm0 = vcmp.lt.s32.totalorder %v517_v17, 7 }
   0x5   :  { %68 = vst [vmem:[#allocation0 + $0x38] sm:$0xff] %v67_v3  ;;  %v85_v13 = vld [vmem:[%s606_s0 + $0x60] sm:$0xff]  ;;  %v87_v15 = vld [vmem:[%s606_s0 + $0x68] sm:$0xff]  ;;  %v89_v18 = vld [vmem:[%s606_s0 + $0x70] sm:$0xff] }
   0x6   :  { %70 = vst [vmem:[#allocation0 + $0x48] sm:$0xff] %v69_v4  ;;  %v91_v20 = vld [vmem:[%s606_s0 + $0x78] sm:$0xff]  ;;  %v125_v24 = vld [vmem:[#allocation0 + $0x27] ss:$-1 sm:$0xff]  ;;  %v139_v28 = vld [vmem:[#allocation0 + $0x37] ss:$-1 sm:$0xff] }
   0x7   :  { %72 = vst [vmem:[#allocation0 + $0x58] sm:$0xff] %v71_v5  ;;  %v126_v29 = vrot.slane %v125_v24, 1  ;;  %v153_v32 = vld [vmem:[#allocation0 + $0x47] ss:$-1 sm:$0xff]  ;;  %v140_v33 = vrot.slane %v139_v28, 1 }
   0x8   :  { %74 = vst [vmem:[#allocation0 + $0x68] sm:$0xff] %v73_v6  ;;  %v167_v36 = vld [vmem:[#allocation0 + $0x57] ss:$-1 sm:$0xff]  ;;  %v154_v37 = vrot.slane %v153_v32, 1  ;;  %v181_v40 = vld [vmem:[#allocation0 + $0x67] ss:$-1 sm:$0xff] }
   0x9   :  { %76 = vst [vmem:[#allocation0 + $0x78] sm:$0xff] %v75_v7  ;;  %v102_v16 = vld [vmem:[#allocation0 + $0xf] ss:$-1 sm:$0xff]  ;;  %v168_v41 = vrot.slane %v167_v36, 1  ;;  %v195_v44 = vld [vmem:[#allocation0 + $0x77] ss:$-1 sm:$0xff] }
   0xa   :  { %78 = vst [vmem:[#allocation0 + $0x88] sm:$0xff] %v77_v8  ;;  %v116_v22 = vld [vmem:[#allocation0 + $0x1f] ss:$-1 sm:$0xff]  ;;  %v103_v23 = vrot.slane %v102_v16, 1  ;;  %v182_v45 = vrot.slane %v181_v40, 1  ;;  %v196_v49 = vrot.slane %v195_v44, 1 }
   0xb   :  { %80 = vst [vmem:[#allocation0 + $0x98] sm:$0xff] %v79_v9  ;;  %v130_v26 = vld [vmem:[#allocation0 + $0x2f] ss:$-1 sm:$0xff]  ;;  %v117_v27 = vrot.slane %v116_v22, 1  ;;  %v209_v48 = vld [vmem:[#allocation0 + $0x87] ss:$-1 sm:$0xff] }
   0xc   :  { %82 = vst [vmem:[#allocation0 + $0xa8] sm:$0xff] %v81_v11  ;;  %v144_v30 = vld [vmem:[#allocation0 + $0x3f] ss:$-1 sm:$0xff]  ;;  %v131_v31 = vrot.slane %v130_v26, 1  ;;  %v223_v52 = vld [vmem:[#allocation0 + $0x97] ss:$-1 sm:$0xff] }
   0xd   :  { %84 = vst [vmem:[#allocation0 + $0xb8] sm:$0xff] %v83_v12  ;;  %v158_v34 = vld [vmem:[#allocation0 + $0x4f] ss:$-1 sm:$0xff]  ;;  %v145_v35 = vrot.slane %v144_v30, 1  ;;  %v210_v53 = vrot.slane %v209_v48, 1  ;;  %v224_v57 = vrot.slane %v223_v52, 1 }
   0xe   :  { %86 = vst [vmem:[#allocation0 + $0xc8] sm:$0xff] %v85_v13  ;;  %v172_v38 = vld [vmem:[#allocation0 + $0x5f] ss:$-1 sm:$0xff]  ;;  %v159_v39 = vrot.slane %v158_v34, 1  ;;  %v237_v56 = vld [vmem:[#allocation0 + $0xa7] ss:$-1 sm:$0xff] }
   0xf   :  { %88 = vst [vmem:[#allocation0 + $0xd8] sm:$0xff] %v87_v15  ;;  %v186_v42 = vld [vmem:[#allocation0 + $0x6f] ss:$-1 sm:$0xff]  ;;  %v173_v43 = vrot.slane %v172_v38, 1  ;;  %v251_v60 = vld [vmem:[#allocation0 + $0xb7] ss:$-1 sm:$0xff] }
  0x10   :  { %90 = vst [vmem:[#allocation0 + $0xe8] sm:$0xff] %v89_v18  ;;  %v200_v46 = vld [vmem:[#allocation0 + $0x7f] ss:$-1 sm:$0xff]  ;;  %v187_v47 = vrot.slane %v186_v42, 1  ;;  %v238_v61 = vrot.slane %v237_v56, 1  ;;  %v252_v1 = vrot.slane %v251_v60, 1 }
  0x11   :  { %92 = vst [vmem:[#allocation0 + $0xf8] sm:$0xff] %v91_v20  ;;  %v214_v50 = vld [vmem:[#allocation0 + $0x8f] ss:$-1 sm:$0xff]  ;;  %v201_v51 = vrot.slane %v200_v46, 1  ;;  %v265_v0 = vld [vmem:[#allocation0 + $0xc7] ss:$-1 sm:$0xff] }
  0x12   :  { %99 = vst [vmem:[#allocation1] sm:$0xff] %v98_v21  ;;  %v228_v54 = vld [vmem:[#allocation0 + $0x9f] ss:$-1 sm:$0xff]  ;;  %v215_v55 = vrot.slane %v214_v50, 1  ;;  %v279_v4 = vld [vmem:[#allocation0 + $0xd7] ss:$-1 sm:$0xff] }
  0x13   :  { %107 = vst.msk [vmem:[#allocation1] sm:$0xff] %vm106_vm0, %v103_v23  ;;  %v242_v58 = vld [vmem:[#allocation0 + $0xaf] ss:$-1 sm:$0xff]  ;;  %v229_v59 = vrot.slane %v228_v54, 1  ;;  %v266_v5 = vrot.slane %v265_v0, 1  ;;  %v280_v9 = vrot.slane %v279_v4, 1 }
  0x14   :  { %113 = vst [vmem:[#allocation1 + $0x8] sm:$0xff] %v112_v25  ;;  %v256_v62 = vld [vmem:[#allocation0 + $0xbf] ss:$-1 sm:$0xff]  ;;  %v243_v63 = vrot.slane %v242_v58, 1  ;;  %v293_v8 = vld [vmem:[#allocation0 + $0xe7] ss:$-1 sm:$0xff] }
  0x15   :  { %121 = vst.msk [vmem:[#allocation1 + $0x8] sm:$0xff] %vm106_vm0, %v117_v27  ;;  %v270_v2 = vld [vmem:[#allocation0 + $0xcf] ss:$-1 sm:$0xff]  ;;  %v257_v3 = vrot.slane %v256_v62, 1  ;;  %v307_v12 = vld [vmem:[#allocation0 + $0xf7] ss:$-1 sm:$0xff] }
  0x16   :  { %127 = vst [vmem:[#allocation1 + $0x10] sm:$0xff] %v126_v29  ;;  %v284_v6 = vld [vmem:[#allocation0 + $0xdf] ss:$-1 sm:$0xff]  ;;  %v271_v7 = vrot.slane %v270_v2, 1  ;;  %v294_v13 = vrot.slane %v293_v8, 1  ;;  %v308_v16 = vrot.slane %v307_v12, 1 }
  0x17   :  { %135 = vst.msk [vmem:[#allocation1 + $0x10] sm:$0xff] %vm106_vm0, %v131_v31  ;;  %v298_v10 = vld [vmem:[#allocation0 + $0xef] ss:$-1 sm:$0xff]  ;;  %v285_v11 = vrot.slane %v284_v6, 1 }
  0x18   :  { %141 = vst [vmem:[#allocation1 + $0x18] sm:$0xff] %v140_v33  ;;  %v312_v14 = vld [vmem:[#allocation0 + $0xff] ss:$-1 sm:$0xff]  ;;  %v299_v15 = vrot.slane %v298_v10, 1 }
  0x19   :  { %149 = vst.msk [vmem:[#allocation1 + $0x18] sm:$0xff] %vm106_vm0, %v145_v35  ;;  %v313_v18 = vrot.slane %v312_v14, 1 }
  0x1a   :  { %155 = vst [vmem:[#allocation1 + $0x20] sm:$0xff] %v154_v37  ;;  %v376_v19 = vld [vmem:[#allocation1] sm:$0xff] }
  0x1b   :  { %163 = vst.msk [vmem:[#allocation1 + $0x20] sm:$0xff] %vm106_vm0, %v159_v39 }
  0x1c   :  { %169 = vst [vmem:[#allocation1 + $0x28] sm:$0xff] %v168_v41  ;;  %v378_v20 = vld [vmem:[#allocation1 + $0x8] sm:$0xff] }
  0x1d   :  { %177 = vst.msk [vmem:[#allocation1 + $0x28] sm:$0xff] %vm106_vm0, %v173_v43 }
  0x1e   :  { %183 = vst [vmem:[#allocation1 + $0x30] sm:$0xff] %v182_v45  ;;  %v380_v17 = vld [vmem:[#allocation1 + $0x10] sm:$0xff] }
  0x1f   :  { %191 = vst.msk [vmem:[#allocation1 + $0x30] sm:$0xff] %vm106_vm0, %v187_v47 }
  0x20   :  { %197 = vst [vmem:[#allocation1 + $0x38] sm:$0xff] %v196_v49  ;;  %v382_v21 = vld [vmem:[#allocation1 + $0x18] sm:$0xff] }
  0x21   :  { %205 = vst.msk [vmem:[#allocation1 + $0x38] sm:$0xff] %vm106_vm0, %v201_v51 }
  0x22   :  { %211 = vst [vmem:[#allocation1 + $0x40] sm:$0xff] %v210_v53  ;;  %v384_v22 = vld [vmem:[#allocation1 + $0x20] sm:$0xff] }
  0x23   :  { %219 = vst.msk [vmem:[#allocation1 + $0x40] sm:$0xff] %vm106_vm0, %v215_v55 }
  0x24   :  { %225 = vst [vmem:[#allocation1 + $0x48] sm:$0xff] %v224_v57  ;;  %v386_v23 = vld [vmem:[#allocation1 + $0x28] sm:$0xff] }
  0x25   :  { %233 = vst.msk [vmem:[#allocation1 + $0x48] sm:$0xff] %vm106_vm0, %v229_v59 }
  0x26   :  { %239 = vst [vmem:[#allocation1 + $0x50] sm:$0xff] %v238_v61  ;;  %v388_v24 = vld [vmem:[#allocation1 + $0x30] sm:$0xff] }
  0x27   :  { %247 = vst.msk [vmem:[#allocation1 + $0x50] sm:$0xff] %vm106_vm0, %v243_v63 }
  0x28   :  { %253 = vst [vmem:[#allocation1 + $0x58] sm:$0xff] %v252_v1  ;;  %v390_v25 = vld [vmem:[#allocation1 + $0x38] sm:$0xff] }
  0x29   :  { %261 = vst.msk [vmem:[#allocation1 + $0x58] sm:$0xff] %vm106_vm0, %v257_v3 }
  0x2a   :  { %267 = vst [vmem:[#allocation1 + $0x60] sm:$0xff] %v266_v5  ;;  %v392_v26 = vld [vmem:[#allocation1 + $0x40] sm:$0xff] }
  0x2b   :  { %275 = vst.msk [vmem:[#allocation1 + $0x60] sm:$0xff] %vm106_vm0, %v271_v7 }
  0x2c   :  { %281 = vst [vmem:[#allocation1 + $0x68] sm:$0xff] %v280_v9  ;;  %v394_v27 = vld [vmem:[#allocation1 + $0x48] sm:$0xff] }
  0x2d   :  { %289 = vst.msk [vmem:[#allocation1 + $0x68] sm:$0xff] %vm106_vm0, %v285_v11 }
  0x2e   :  { %295 = vst [vmem:[#allocation1 + $0x70] sm:$0xff] %v294_v13  ;;  %v396_v28 = vld [vmem:[#allocation1 + $0x50] sm:$0xff] }
  0x2f   :  { %303 = vst.msk [vmem:[#allocation1 + $0x70] sm:$0xff] %vm106_vm0, %v299_v15 }
  0x30   :  { %309 = vst [vmem:[#allocation1 + $0x78] sm:$0xff] %v308_v16  ;;  %v398_v29 = vld [vmem:[#allocation1 + $0x58] sm:$0xff] }
  0x31   :  { %317 = vst.msk [vmem:[#allocation1 + $0x78] sm:$0xff] %vm106_vm0, %v313_v18 }
  0x32   :  { %377 = vst [vmem:[%s607_s1] sm:$0xff] %v376_v19  ;;  %v400_v30 = vld [vmem:[#allocation1 + $0x60] sm:$0xff] }
  0x33   :  { %379 = vst [vmem:[%s607_s1 + $0x8] sm:$0xff] %v378_v20 }
  0x34   :  { %381 = vst [vmem:[%s607_s1 + $0x10] sm:$0xff] %v380_v17  ;;  %v402_v31 = vld [vmem:[#allocation1 + $0x68] sm:$0xff] }
  0x35   :  { %383 = vst [vmem:[%s607_s1 + $0x18] sm:$0xff] %v382_v21 }
  0x36   :  { %385 = vst [vmem:[%s607_s1 + $0x20] sm:$0xff] %v384_v22  ;;  %v404_v32 = vld [vmem:[#allocation1 + $0x70] sm:$0xff] }
  0x37   :  { %387 = vst [vmem:[%s607_s1 + $0x28] sm:$0xff] %v386_v23 }
  0x38   :  { %389 = vst [vmem:[%s607_s1 + $0x30] sm:$0xff] %v388_v24  ;;  %v406_v33 = vld [vmem:[#allocation1 + $0x78] sm:$0xff] }
  0x39   :  { %391 = vst [vmem:[%s607_s1 + $0x38] sm:$0xff] %v390_v25 }
  0x3a   :  { %393 = vst [vmem:[%s607_s1 + $0x40] sm:$0xff] %v392_v26 }
  0x3b   :  { %395 = vst [vmem:[%s607_s1 + $0x48] sm:$0xff] %v394_v27 }
  0x3c   :  { %397 = vst [vmem:[%s607_s1 + $0x50] sm:$0xff] %v396_v28 }
  0x3d   :  { %399 = vst [vmem:[%s607_s1 + $0x58] sm:$0xff] %v398_v29 }
  0x3e   :  { %401 = vst [vmem:[%s607_s1 + $0x60] sm:$0xff] %v400_v30 }
  0x3f   :  { %403 = vst [vmem:[%s607_s1 + $0x68] sm:$0xff] %v402_v31 }
  0x40   :  { %405 = vst [vmem:[%s607_s1 + $0x70] sm:$0xff] %v404_v32 }
  0x41   :  { %407 = vst [vmem:[%s607_s1 + $0x78] sm:$0xff] %v406_v33 }

// kernel: fno_forward.8
= control target key start
LH: loop header
LB: loop body
LE: loop exit
PB: predicated region body
PF: predicated region fallthrough
CT: control target
= control target key end

     0   :  { %s416_s12 = smov 0   ;;  %s444_s0 = inlined_call_operand.vmem [shape: f32[8,512], index: 0, kind: input, shape index: {}]   ;;  %s445_s1 = inlined_call_operand.vmem [shape: f32[8,8], index: 1, kind: input, shape index: {}]   ;;  %s446_s2 = inlined_call_operand.vmem [shape: f32[8,512], index: 2, kind: input, shape index: {}]   ;;  %s447_s3 = inlined_call_operand.vmem [shape: f32[8,512], index: 3, kind: output, shape index: {}]  }
   0x1 LB: > { %s355_s13 = sadd.s32 4294967295, %s394_s12   ;;  %p359_p0 = scmp.ge.s32.totalorder %s394_s12, 1  ;;  %s394_s12 = sphi %s416_s12, %s13_s12  }
   0x2   : > { %p149_p1 = scmp.lt.s32.totalorder %s394_s12, 3 }
   0x4   : > { %p150_p2 = pnand %p359_p0, %p149_p1 }
   0x5   : > { %s360_s14 = sshll.u32 (!%p150_p2), %s355_s13, 1 }
   0x6   : > { %153 = sbr.rel (%p150_p2) target bundleno = 176 (0xb0), region = 32  ;;  %p179_p3 = scmp.lt.s32.totalorder (!%p150_p2), %s360_s14, 3 }
   0xb   : > { %s449_s14 = smov (!%p179_p3, %s360_s14), 3  ;;  %v196_v0 = vld [vmem:[%s445_s1] sm:$0xff]  ;;  %vm201_vm0 = vcmask 64512  }
   0xc   : > { %s424_s15 = sshll.u32 %s449_s14, 3 }
   0xd   : > { %s182_s18 = scalar_lea.vmem %s444_s0, %s424_s15  ;;  %s188_s23 = scalar_lea.vmem %s446_s2, %s424_s15 }
   0xe   : > { %v197_v1 = vld [vmem:[%s182_s18] sm:$0xff]  ;;  %v198_v2 = vld [vmem:[%s182_s18 + $0x8] sm:$0xff]  ;;  %s194_s26 = scalar_lea.vmem %s447_s3, %s424_s15 }
   0xf   : > { %220 = vmatpush.msra.mxu0 %v197_v1  ;;  %240 = vmatpush.msra.mxu1 %v198_v2  ;;  %v199_v3 = vld [vmem:[%s188_s23] sm:$0xff]  ;;  %v200_v4 = vld [vmem:[%s188_s23 + $0x8] sm:$0xff] }
  0x10   : > { %366 = vmatmul.msk.f32.vlgmr.msra.gmra.mxu0 %vm201_vm0, %v196_v0  ;;  %367 = vmatmul.msk.f32.vlgmr.msra.gmra.mxu1 %vm201_vm0, %v196_v0 }
  0x8d   : > { %v222_v5 = vpop.f32.mrf.mxu0  ;;  %v242_v6 = vpop.f32.mrf.mxu1 }
  0x8e   : > { %v223_v7 = vadd.f32 %v222_v5, %v199_v3  ;;  %v243_v8 = vadd.f32 %v242_v6, %v200_v4 }
  0x90   : > { %v368_v9 = vmul.f32 -1.442695, %v223_v7  ;;  %v369_v10 = vmul.f32 -1.442695, %v243_v8 }
  0x92   : > { %380 = vpow2.f32 %v368_v9 }
  0x93   : > { %382 = vpow2.f32 %v369_v10 }
  0x98   : > { %v381_v11 = vpop.eup %380 }
  0x99   : > { %v383_v12 = vpop.eup %382  ;;  %v251_v13 = vadd.f32 1.0, %v381_v11 }
  0x9a   : > { %v252_v14 = vadd.f32 1.0, %v383_v12 }
  0x9b   : > { %384 = vrcp.f32 %v251_v13  ;;  %v264_v20 = vand.u32 2147483648, %v251_v13  ;;  %v262_v23 = vand.u32 2147483647, %v251_v13  ;;  %vm258_vm3 = vweird.f32 %v251_v13 }
  0x9c   : > { %386 = vrcp.f32 %v252_v14  ;;  %v279_v24 = vand.u32 2147483648, %v252_v14  ;;  %v277_v26 = vand.u32 2147483647, %v252_v14  ;;  %vm273_vm5 = vweird.f32 %v252_v14 }
  0x9d   : > { %v265_v28 = vor.u32 1.1754944e-38, %v264_v20  ;;  %vm263_vm6 = vcmp.eq.f32.partialorder %v262_v23, 8.507059e+37 }
  0x9e   : > { %v280_v31 = vor.u32 1.1754944e-38, %v279_v24  ;;  %vm278_vm8 = vcmp.eq.f32.partialorder %v277_v26, 8.507059e+37 }
  0xa1   : > { %v385_v15 = vpop.eup %384 }
  0xa2   : > { %v387_v16 = vpop.eup %386  ;;  %v254_v17 = vmul.f32 %v385_v15, %v251_v13  ;;  %vm259_vm1 = vweird.f32 %v385_v15 }
  0xa3   : > { %v269_v18 = vmul.f32 %v387_v16, %v252_v14  ;;  %vm274_vm2 = vweird.f32 %v387_v16  ;;  %vm260_vm4 = vmor %vm258_vm3, %vm259_vm1 }
  0xa4   : > { %v255_v19 = vsub.f32 1.0, %v254_v17  ;;  %vm275_vm7 = vmor %vm273_vm5, %vm274_vm2 }
  0xa5   : > { %v270_v21 = vsub.f32 1.0, %v269_v18 }
  0xa6   : > { %v256_v22 = vmul.f32 %v385_v15, %v255_v19 }
  0xa7   : > { %v271_v25 = vmul.f32 %v387_v16, %v270_v21 }
  0xa8   : > { %v257_v27 = vadd.f32 %v385_v15, %v256_v22 }
  0xa9   : > { %v272_v29 = vadd.f32 %v387_v16, %v271_v25 }
  0xaa   : > { %v261_v30 = vsel %vm260_vm4, %v385_v15, %v257_v27 }
  0xab   : > { %v266_v32 = vsel %vm263_vm6, %v265_v28, %v261_v30  ;;  %v276_v33 = vsel %vm275_vm7, %v387_v16, %v272_v29 }
  0xac   : > { %v283_v34 = vmul.f32 %v266_v32, %v223_v7  ;;  %v281_v35 = vsel %vm278_vm8, %v280_v31, %v276_v33 }
  0xad   : > { %v284_v36 = vmul.f32 %v281_v35, %v243_v8 }
  0xae   : > { %285 = vst [vmem:[%s194_s26] sm:$0xff] %v283_v34 }
  0xaf   : > { %286 = vst [vmem:[%s194_s26 + $0x8] sm:$0xff] %v284_v36 }
  0xb0 PF: > { %s13_s12 = sadd.s32 1, %s394_s12  }
  0xb1   : > { %p10_p4 = scmp.ge.s32.totalorder %s13_s12, 4  }
  0xb3   :  { %12 = sbr.rel (!%p10_p4) target bundleno = 1 (0x1), region = 65 }

// kernel: fno_forward.10
= control target key start
LH: loop header
LB: loop body
LE: loop exit
PB: predicated region body
PF: predicated region fallthrough
CT: control target
= control target key end

     0   :  { %s366_s12 = smov 0   ;;  %s389_s0 = inlined_call_operand.vmem [shape: f32[8,512], index: 0, kind: input, shape index: {}]   ;;  %s390_s1 = inlined_call_operand.vmem [shape: f32[8,8], index: 1, kind: input, shape index: {}]   ;;  %s391_s2 = inlined_call_operand.vmem [shape: f32[8,512], index: 2, kind: input, shape index: {}]   ;;  %s392_s3 = inlined_call_operand.vmem [shape: f32[8,512], index: 3, kind: output, shape index: {}]  }
   0x1 LB: > { %s315_s13 = sadd.s32 4294967295, %s344_s12   ;;  %p319_p0 = scmp.ge.s32.totalorder %s344_s12, 1  ;;  %s344_s12 = sphi %s366_s12, %s13_s12  }
   0x2   : > { %p149_p1 = scmp.lt.s32.totalorder %s344_s12, 3 }
   0x4   : > { %p150_p2 = pnand %p319_p0, %p149_p1 }
   0x5   : > { %s320_s14 = sshll.u32 (!%p150_p2), %s315_s13, 1 }
   0x6   : > { %153 = sbr.rel (%p150_p2) target bundleno = 146 (0x92), region = 32  ;;  %p179_p3 = scmp.lt.s32.totalorder (!%p150_p2), %s320_s14, 3 }
   0xb   : > { %s394_s14 = smov (!%p179_p3, %s320_s14), 3  ;;  %v196_v0 = vld [vmem:[%s390_s1] sm:$0xff]  ;;  %vm201_vm0 = vcmask 64512  }
   0xc   : > { %s321_s15 = sshll.u32 %s394_s14, 3 }
   0xd   : > { %s182_s18 = scalar_lea.vmem %s389_s0, %s321_s15  ;;  %s188_s23 = scalar_lea.vmem %s391_s2, %s321_s15 }
   0xe   : > { %v197_v1 = vld [vmem:[%s182_s18] sm:$0xff]  ;;  %v198_v2 = vld [vmem:[%s182_s18 + $0x8] sm:$0xff]  ;;  %s194_s26 = scalar_lea.vmem %s392_s3, %s321_s15 }
   0xf   : > { %220 = vmatpush.msra.mxu0 %v197_v1  ;;  %240 = vmatpush.msra.mxu1 %v198_v2  ;;  %v199_v3 = vld [vmem:[%s188_s23] sm:$0xff]  ;;  %v200_v4 = vld [vmem:[%s188_s23 + $0x8] sm:$0xff] }
  0x10   : > { %326 = vmatmul.msk.f32.vlgmr.msra.gmra.mxu0 %vm201_vm0, %v196_v0  ;;  %327 = vmatmul.msk.f32.vlgmr.msra.gmra.mxu1 %vm201_vm0, %v196_v0 }
  0x8d   : > { %v222_v5 = vpop.f32.mrf.mxu0  ;;  %v242_v6 = vpop.f32.mrf.mxu1 }
  0x8e   : > { %v223_v7 = vadd.f32 %v222_v5, %v199_v3  ;;  %v243_v8 = vadd.f32 %v242_v6, %v200_v4 }
  0x90   : > { %245 = vst [vmem:[%s194_s26] sm:$0xff] %v223_v7 }
  0x91   : > { %246 = vst [vmem:[%s194_s26 + $0x8] sm:$0xff] %v243_v8 }
  0x92 PF: > { %s13_s12 = sadd.s32 1, %s344_s12  }
  0x93   : > { %p10_p4 = scmp.ge.s32.totalorder %s13_s12, 4  }
  0x95   :  { %12 = sbr.rel (!%p10_p4) target bundleno = 1 (0x1), region = 65 }

// kernel: fno_forward.11
= control target key start
LH: loop header
LB: loop body
LE: loop exit
PB: predicated region body
PF: predicated region fallthrough
CT: control target
= control target key end

     0   :  { %s718_s20 = smov 0   ;;  %s952_s0 = inlined_call_operand.vmem [shape: f32[8,512], index: 0, kind: input, shape index: {}]   ;;  %s953_s1 = inlined_call_operand.vmem [shape: f32[32,8], index: 1, kind: input, shape index: {}]   ;;  %s954_s2 = inlined_call_operand.vmem [shape: f32[32,1], index: 2, kind: input, shape index: {}]   ;;  %s955_s3 = inlined_call_operand.vmem [shape: f32[1,32], index: 3, kind: input, shape index: {}]   ;;  %s956_s4 = inlined_call_operand.<no memory space> [shape: f32[1,1], index: 4, kind: input, shape index: {}]   ;;  %s957_s5 = inlined_call_operand.vmem [shape: f32[1,512], index: 5, kind: output, shape index: {}]  }
   0x1   :  { %v10_v0 = vstv %s956_s4 }
   0x2   :  { %11 = vst [vmem:[#allocation2] sm:$0x1] %v10_v0 }
   0x3 LB: > { %s602_s21 = sadd.s32 4294967295, %s682_s20   ;;  %p606_p0 = scmp.ge.s32.totalorder %s682_s20, 1  ;;  %s682_s20 = sphi %s718_s20, %s17_s20  }
   0x4   : > { %p190_p1 = scmp.lt.s32.totalorder %s682_s20, 3 }
   0x6   : > { %p191_p2 = pnand %p606_p0, %p190_p1 }
   0x7   : > { %s607_s22 = sshll.u32 (!%p191_p2), %s602_s21, 1 }
   0x8   : > { %194 = sbr.rel (%p191_p2) target bundleno = 339 (0x153), region = 40  ;;  %p218_p3 = scmp.lt.s32.totalorder (!%p191_p2), %s607_s22, 3 }
   0xd   : > { %v235_v1 = vld [vmem:[%s954_s2 + $0x8] sm:$0xff]  ;;  %v684_v2 = vmov 0   ;;  %v237_v3 = vld [vmem:[%s954_s2 + $0x18] sm:$0xff]  ;;  %s975_s22 = smov (!%p218_p3, %s607_s22), 3  ;;  %v230_v4 = vld [vmem:[%s953_s1] sm:$0xff]  ;;  %vm258_vm0 = vcmask 64512  }
   0xe   : > { %642 = vset.pattern.permute.xlu1 %v684_v2  ;;  %641 = vset.pattern.permute.xlu0 %v684_v2  ;;  %s608_s26 = sshll.u32 %s975_s22, 3  ;;  %v233_v7 = vld [vmem:[%s953_s1 + $0x18] sm:$0xff]  ;;  %v234_v8 = vld [vmem:[%s954_s2] sm:$0xff]  ;;  %v236_v9 = vld [vmem:[%s954_s2 + $0x10] sm:$0xff]  ;;  %s226_s23 = scalar_lea.vmem %s957_s5, %s975_s22 }
   0xf   : > { %245 = vperm.xlu1 %642, %v235_v1   ;;  %255 = vperm.xlu0 %641, %v237_v3   ;;  %s221_s29 = scalar_lea.vmem %s952_s0, %s608_s26  ;;  %v231_v10 = vld [vmem:[%s953_s1 + $0x8] sm:$0xff]  ;;  %v232_v11 = vld [vmem:[%s953_s1 + $0x10] sm:$0xff]  ;;  %v490_v55 = vld [vmem:[#allocation2] sm:$0x1] }
  0x10   : > { %643 = vset.pattern.permute.xlu2 %v684_v2  ;;  %v228_v5 = vld [vmem:[%s221_s29] sm:$0xff]  ;;  %v229_v6 = vld [vmem:[%s221_s29 + $0x8] sm:$0xff] }
  0x11   : > { %286 = vmatpush.msra.mxu0 %v228_v5  ;;  %630 = vmatpush.msra.mxu2 %v228_v5 }
  0x12   : > { %315 = vmatpush.msra.mxu1 %v229_v6  ;;  %631 = vmatpush.msra.mxu3 %v229_v6 }
  0x13   : > { %610 = vmatmul.msk.f32.vlgmr.msra.gmra.mxu0 %vm258_vm0, %v230_v4  ;;  %613 = vmatmul.msk.f32.vlgmr.msra.gmra.mxu2 %vm258_vm0, %v233_v7 }
  0x14   : > { %614 = vmatmul.msk.f32.vlgmr.msra.gmra.mxu1 %vm258_vm0, %v230_v4  ;;  %617 = vmatmul.msk.f32.vlgmr.msra.gmra.mxu3 %vm258_vm0, %v233_v7 }
  0x15   : > { %493 = vperm.xlu2 %643, %v490_v55  }
  0x17   : > { %240 = vperm.xlu1 %642, %v234_v8   ;;  %250 = vperm.xlu0 %641, %v236_v9  }
  0x1b   : > { %611 = vmatmul.msk.f32.gmra.mxu0 %vm258_vm0, %v231_v10 }
  0x1c   : > { %615 = vmatmul.msk.f32.gmra.mxu1 %vm258_vm0, %v231_v10 }
  0x23   : > { %612 = vmatmul.msk.f32.gmra.mxu0 %vm258_vm0, %v232_v11 }
  0x24   : > { %616 = vmatmul.msk.f32.gmra.mxu1 %vm258_vm0, %v232_v11 }
  0x81   : > { %v246_v12 = vpop.permute.xlu1 %245  ;;  %v256_v20 = vpop.permute.xlu0 %255 }
  0x89   : > { %v241_v13 = vpop.permute.xlu1 %240  ;;  %v251_v37 = vpop.permute.xlu0 %250 }
  0x90   : > { %v288_v14 = vpop.f32.mrf.mxu0 }
  0x91   : > { %v764_v15 = vadd.f32 %v288_v14, %v241_v13  ;;  %v317_v16 = vpop.f32.mrf.mxu1 }
  0x92   : > { %v766_v17 = vadd.f32 %v317_v16, %v241_v13 }
  0x93   : > { %v618_v18 = vmul.f32 -1.442695, %v764_v15 }
  0x94   : > { %v619_v19 = vmul.f32 -1.442695, %v766_v17 }
  0x95   : > { %644 = vpow2.f32 %v618_v18 }
  0x96   : > { %646 = vpow2.f32 %v619_v19  ;;  %v297_v21 = vpop.f32.mrf.mxu2 }
  0x97   : > { %v770_v22 = vadd.f32 %v297_v21, %v256_v20  ;;  %v326_v23 = vpop.f32.mrf.mxu3 }
  0x98   : > { %v772_v24 = vadd.f32 %v326_v23, %v256_v20  ;;  %v291_v25 = vpop.f32.mrf.mxu0 }
  0x99   : > { %v624_v26 = vmul.f32 -1.442695, %v770_v22  ;;  %v775_v27 = vadd.f32 %v291_v25, %v246_v12  ;;  %v320_v28 = vpop.f32.mrf.mxu1 }
  0x9a   : > { %v625_v29 = vmul.f32 -1.442695, %v772_v24  ;;  %v778_v30 = vadd.f32 %v320_v28, %v246_v12 }
  0x9b   : > { %v645_v31 = vpop.eup %644  ;;  %648 = vpow2.f32 %v624_v26  ;;  %v620_v32 = vmul.f32 -1.442695, %v775_v27 }
  0x9c   : > { %v647_v33 = vpop.eup %646  ;;  %650 = vpow2.f32 %v625_v29  ;;  %v621_v34 = vmul.f32 -1.442695, %v778_v30  ;;  %v782_v35 = vadd.f32 1.0, %v645_v31 }
  0x9d   : > { %652 = vpow2.f32 %v620_v32  ;;  %v784_v36 = vadd.f32 1.0, %v647_v33 }
  0x9e   : > { %654 = vpow2.f32 %v621_v34  ;;  %v372_v53 = vand.u32 2147483648, %v782_v35  ;;  %v370_v60 = vand.u32 2147483647, %v782_v35  ;;  %vm366_vm6 = vweird.f32 %v782_v35 }
  0x9f   : > { %656 = vrcp.f32 %v782_v35  ;;  %v385_v61 = vand.u32 2147483647, %v784_v36  ;;  %v387_v62 = vand.u32 2147483648, %v784_v36  ;;  %vm381_vm11 = vweird.f32 %v784_v36 }
  0xa0   : > { %v294_v38 = vpop.f32.mrf.mxu0  ;;  %658 = vrcp.f32 %v784_v36  ;;  %v810_v2 = vor.u32 1.1754944e-38, %v372_v53 }
  0xa1   : > { %v649_v39 = vpop.eup %648  ;;  %v786_v40 = vadd.f32 %v294_v38, %v251_v37  ;;  %v323_v41 = vpop.f32.mrf.mxu1 }
  0xa2   : > { %v651_v42 = vpop.eup %650  ;;  %v359_v43 = vadd.f32 1.0, %v649_v39  ;;  %v789_v44 = vadd.f32 %v323_v41, %v251_v37 }
  0xa3   : > { %v653_v45 = vpop.eup %652  ;;  %v360_v46 = vadd.f32 1.0, %v651_v42  ;;  %v622_v47 = vmul.f32 -1.442695, %v786_v40 }
  0xa4   : > { %660 = vrcp.f32 %v359_v43  ;;  %v793_v48 = vadd.f32 1.0, %v653_v45  ;;  %v623_v49 = vmul.f32 -1.442695, %v789_v44  ;;  %v655_v50 = vpop.eup %654  ;;  %v460_v57 = vand.u32 2147483647, %v359_v43 }
  0xa5   : > { %662 = vrcp.f32 %v360_v46  ;;  %v797_v51 = vadd.f32 1.0, %v655_v50  ;;  %v799_v52 = vpop.eup %656  ;;  %vm456_vm1 = vweird.f32 %v359_v43  ;;  %v462_v0 = vand.u32 2147483648, %v359_v43 }
  0xa6   : > { %664 = vrcp.f32 %v793_v48  ;;  %v802_v54 = vpop.eup %658  ;;  %vm471_vm2 = vweird.f32 %v360_v46  ;;  %v475_v5 = vand.u32 2147483647, %v360_v46  ;;  %vm816_vm3 = vcmp.eq.f32.partialorder %v460_v57, 8.507059e+37 }
  0xa7   : > { %666 = vpow2.f32 %v622_v47  ;;  %v477_v11 = vand.u32 2147483648, %v360_v46  ;;  %v362_v14 = vmul.f32 %v799_v52, %v782_v35  ;;  %v377_v19 = vmul.f32 %v802_v54, %v784_v36 }
  0xa8   : > { %668 = vpow2.f32 %v623_v49  ;;  %v463_v21 = vor.u32 1.1754944e-38, %v462_v0  ;;  %vm476_vm8 = vcmp.eq.f32.partialorder %v475_v5, 8.507059e+37  ;;  %vm396_vm9 = vweird.f32 %v793_v48 }
  0xa9   : > { %670 = vrcp.f32 %v797_v51  ;;  %v478_v26 = vor.u32 1.1754944e-38, %v477_v11  ;;  %v400_v28 = vand.u32 2147483647, %v793_v48  ;;  %v402_v31 = vand.u32 2147483648, %v793_v48 }
  0xaa   : > { %v661_v56 = vpop.eup %660  ;;  %v363_v33 = vsub.f32 1.0, %v362_v14  ;;  %v415_v38 = vand.u32 2147483647, %v797_v51  ;;  %v378_v39 = vsub.f32 1.0, %v377_v19  ;;  %vm411_vm12 = vweird.f32 %v797_v51 }
  0xab   : > { %v663_v58 = vpop.eup %662  ;;  %v452_v59 = vmul.f32 %v661_v56, %v359_v43  ;;  %vm457_vm4 = vweird.f32 %v661_v56  ;;  %v417_v49 = vand.u32 2147483648, %v797_v51  ;;  %vm367_vm13 = vweird.f32 %v799_v52 }
  0xac   : > { %v808_v63 = vpop.eup %664  ;;  %v467_v1 = vmul.f32 %v663_v58, %v360_v46  ;;  %vm472_vm5 = vweird.f32 %v663_v58  ;;  %vm458_vm7 = vmor %vm456_vm1, %vm457_vm4  ;;  %vm849_vm14 = vcmp.eq.f32.partialorder %v400_v28, 8.507059e+37  ;;  %v364_v57 = vmul.f32 %v799_v52, %v363_v33 }
  0xad   : > { %v667_v3 = vpop.eup %666  ;;  %v453_v4 = vsub.f32 1.0, %v452_v59  ;;  %v392_v6 = vmul.f32 %v808_v63, %v793_v48  ;;  %vm473_vm10 = vmor %vm471_vm2, %vm472_vm5  ;;  %vm397_vm15 = vweird.f32 %v808_v63  ;;  %vm857_vm0 = vcmp.eq.f32.partialorder %v415_v38, 8.507059e+37 }
  0xae   : > { %v669_v7 = vpop.eup %668  ;;  %v814_v8 = vadd.f32 1.0, %v667_v3  ;;  %v468_v10 = vsub.f32 1.0, %v467_v1  ;;  %v379_v59 = vmul.f32 %v802_v54, %v378_v39  ;;  %vm382_vm1 = vweird.f32 %v802_v54  ;;  %vm879_vm4 = vmor %vm366_vm6, %vm367_vm13 }
  0xaf   : > { %v820_v12 = vadd.f32 1.0, %v669_v7  ;;  %v454_v13 = vmul.f32 %v661_v56, %v453_v4  ;;  %v824_v16 = vpop.eup %670  ;;  %v393_v23 = vsub.f32 1.0, %v392_v6  ;;  %vm868_vm2 = vcmp.eq.f32.partialorder %v370_v60, 8.507059e+37  ;;  %vm898_vm6 = vmor %vm381_vm11, %vm382_vm1 }
  0xb0   : > { %672 = vrcp.f32 %v814_v8  ;;  %v469_v18 = vmul.f32 %v663_v58, %v468_v10  ;;  %v407_v32 = vmul.f32 %v824_v16, %v797_v51  ;;  %v430_v1 = vand.u32 2147483647, %v814_v8 }
  0xb1   : > { %674 = vrcp.f32 %v820_v12  ;;  %v455_v20 = vadd.f32 %v661_v56, %v454_v13  ;;  %v394_v43 = vmul.f32 %v808_v63, %v393_v23  ;;  %v432_v3 = vand.u32 2147483648, %v814_v8 }
  0xb2   : > { %v470_v25 = vadd.f32 %v663_v58, %v469_v18  ;;  %v408_v45 = vsub.f32 1.0, %v407_v32  ;;  %v445_v7 = vand.u32 2147483647, %v820_v12  ;;  %v447_v60 = vand.u32 2147483648, %v820_v12 }
  0xb3   : > { %v459_v29 = vsel %vm458_vm7, %v661_v56, %v455_v20  ;;  %v395_v4 = vadd.f32 %v808_v63, %v394_v43  ;;  %vm888_vm7 = vmor %vm396_vm9, %vm397_vm15  ;;  %v365_v14 = vadd.f32 %v799_v52, %v364_v57  ;;  %v418_v35 = vor.u32 1.1754944e-38, %v417_v49 }
  0xb4   : > { %v464_v34 = vsel %vm816_vm3, %v463_v21, %v459_v29  ;;  %v474_v37 = vsel %vm473_vm10, %v663_v58, %v470_v25  ;;  %v409_v56 = vmul.f32 %v824_v16, %v408_v45  ;;  %vm412_vm3 = vweird.f32 %v824_v16 }
  0xb5   : > { %v487_v41 = vmul.f32 %v464_v34, %v770_v22  ;;  %v479_v42 = vsel %vm476_vm8, %v478_v26, %v474_v37  ;;  %v403_v22 = vor.u32 1.1754944e-38, %v402_v31  ;;  %v380_v19 = vadd.f32 %v802_v54, %v379_v59  ;;  %vm911_vm13 = vmor %vm411_vm12, %vm412_vm3 }
  0xb6   : > { %v673_v46 = vpop.eup %672  ;;  %v488_v47 = vmul.f32 %v479_v42, %v772_v24  ;;  %v410_v9 = vadd.f32 %v824_v16, %v409_v56  ;;  %vm426_vm9 = vweird.f32 %v814_v8  ;;  %vm441_vm10 = vweird.f32 %v820_v12 }
  0xb7   : > { %v675_v50 = vpop.eup %674  ;;  %513 = vmatpush.msrb.mxu2 %v487_v41  ;;  %v422_v53 = vmul.f32 %v673_v46, %v814_v8  ;;  %vm427_vm5 = vweird.f32 %v673_v46  ;;  %v399_v21 = vsel %vm888_vm7, %v808_v63, %v395_v4  ;;  %vm431_vm15 = vcmp.eq.f32.partialorder %v430_v1, 8.507059e+37 }
  0xb8   : > { %533 = vmatpush.msrb.mxu3 %v488_v47  ;;  %v437_v24 = vmul.f32 %v675_v50, %v820_v12  ;;  %vm442_vm8 = vweird.f32 %v675_v50  ;;  %vm428_vm11 = vmor %vm426_vm9, %vm427_vm5  ;;  %v433_v25 = vor.u32 1.1754944e-38, %v432_v3  ;;  %v414_v8 = vsel %vm911_vm13, %v824_v16, %v410_v9 }
  0xb9   : > { %v423_v0 = vsub.f32 1.0, %v422_v53  ;;  %vm443_vm1 = vmor %vm441_vm10, %vm442_vm8  ;;  %vm446_vm7 = vcmp.eq.f32.partialorder %v445_v7, 8.507059e+37  ;;  %v448_v63 = vor.u32 1.1754944e-38, %v447_v60  ;;  %v369_v51 = vsel %vm879_vm4, %v799_v52, %v365_v14 }
  0xba   : > { %v438_v6 = vsub.f32 1.0, %v437_v24  ;;  %v404_v31 = vsel %vm849_vm14, %v403_v22, %v399_v21  ;;  %v384_v32 = vsel %vm898_vm6, %v802_v54, %v380_v19  ;;  %v419_v34 = vsel %vm857_vm0, %v418_v35, %v414_v8 }
  0xbb   : > { %v424_v11 = vmul.f32 %v673_v46, %v423_v0  ;;  %v388_v37 = vor.u32 1.1754944e-38, %v387_v62  ;;  %v374_v38 = vsel %vm868_vm2, %v810_v2, %v369_v51  ;;  %vm386_vm12 = vcmp.eq.f32.partialorder %v385_v61, 8.507059e+37 }
  0xbc   : > { %v439_v18 = vmul.f32 %v675_v50, %v438_v6  ;;  %v483_v54 = vmul.f32 %v404_v31, %v775_v27  ;;  %v484_v39 = vmul.f32 %v419_v34, %v778_v30  ;;  %v481_v41 = vmul.f32 %v374_v38, %v764_v15  ;;  %v494_v27 = vpop.permute.xlu2 %493 }
  0xbd   : > { %v425_v48 = vadd.f32 %v673_v46, %v424_v11  ;;  %vm497_vm14 = vcmask 261120   ;;  %v496_v61 = vperm.slane %v494_v27, 0  ;;  %v547_v62 = vlaneseq }
  0xbe   : > { %v440_v26 = vadd.f32 %v675_v50, %v439_v18  ;;  %vm544_vm0 = vcmask 1040384  }
  0xbf   : > { %v429_v12 = vsel %vm428_vm11, %v673_v46, %v425_v48  ;;  %vm549_vm2 = vcmp.lt.s32.totalorder %v547_v62, 256 }
  0xc0   : > { %v434_v28 = vsel %vm431_vm15, %v433_v25, %v429_v12  ;;  %v444_v29 = vsel %vm443_vm1, %v675_v50, %v440_v26 }
  0xc1   : > { %v485_v16 = vmul.f32 %v434_v28, %v786_v40  ;;  %v449_v33 = vsel %vm446_vm7, %v448_v63, %v444_v29  ;;  %v389_v40 = vsel %vm386_vm12, %v388_v37, %v384_v32 }
  0xc2   : > { %v486_v52 = vmul.f32 %v449_v33, %v789_v44  ;;  %v489_v44 = vld [vmem:[%s955_s3] sm:$0x1]  ;;  %v482_v36 = vmul.f32 %v389_v40, %v766_v17 }
  0xc3   : > { %514 = vmatpush.msrb.mxu2 %v485_v16 }
  0xc4   : > { %534 = vmatpush.msrb.mxu3 %v486_v52 }
  0xc5   : > { %515 = vmatpush.msrb.mxu2 %v483_v54 }
  0xc6   : > { %535 = vmatpush.msrb.mxu3 %v484_v39 }
  0xc7   : > { %516 = vmatpush.msrb.mxu2 %v481_v41 }
  0xc8   : > { %536 = vmatpush.msrb.mxu3 %v482_v36  ;;  %626 = vmatmul.msk.f32.vlgmr.msrb.gmra.mxu2 %vm497_vm14, %v489_v44 }
  0xc9   : > { %627 = vmatmul.msk.f32.vlgmr.msrb.gmra.mxu3 %vm497_vm14, %v489_v44 }
 0x14b   : > { %v518_v2 = vpop.f32.mrf.mxu2 }
 0x14c   : > { %v538_v30 = vpop.f32.mrf.mxu3  ;;  %v519_v43 = vadd.f32 %v518_v2, %v496_v61 }
 0x14d   : > { %v539_v42 = vadd.f32 %v538_v30, %v496_v61 }
 0x14f   : > { %v543_v15 = vrot.slane %v539_v42, 7 }
 0x151   : > { %v545_v45 = vsel %vm544_vm0, %v519_v43, %v543_v15 }
 0x152   : > { %551 = vst.msk [vmem:[%s226_s23] sm:$0x3] %vm549_vm2, %v545_v45 }
 0x153 PF: > { %s17_s20 = sadd.s32 1, %s682_s20  }
 0x154   : > { %p14_p4 = scmp.ge.s32.totalorder %s17_s20, 4  }
 0x156   :  { %16 = sbr.rel (!%p14_p4) target bundleno = 3 (0x3), region = 70 }

</bundles_post_ra>
